<compile_context>
chip_gen: v7x
topology: tpu7x:2x2x1
jax: 0.10.0
libtpu: 0.0.40
codegen_flags: <defaults>
</compile_context>

<pallas_src>
import functools
import math

import jax
import jax.numpy as jnp
from jax import lax
from jax.experimental import pallas as pl
from jax.experimental.pallas import tpu as pltpu


# ---------------------------------------------------------------------------
# shared math helpers (used inside the kernel and in the pure-JAX reference)
# ---------------------------------------------------------------------------
def _layernorm(x, gamma, beta, eps=1e-5):
    mu = jnp.mean(x, axis=-1, keepdims=True)
    xc = x - mu
    var = jnp.mean(xc * xc, axis=-1, keepdims=True)
    return xc / jnp.sqrt(var + eps) * gamma + beta


def _gelu(x):
    c = math.sqrt(2.0 / math.pi)
    return 0.5 * x * (1.0 + jnp.tanh(c * (x + 0.044715 * x * x * x)))


# ---------------------------------------------------------------------------
# fused kernel: embeddings -> L transformer blocks -> final LN + logits
# grid = (batch, layer); residual stream lives in x_sc (VMEM) per batch.
# ---------------------------------------------------------------------------
def _fused_kernel(idx_ref, admet_ref, sidx_ref, tok_ref, pos_ref, adw_ref,
                  adb_ref, scaf_ref, bias_ref,
                  g1_ref, be1_ref, wqkv_ref, wp_ref, bp_ref,
                  g2_ref, be2_ref, w1_ref, fb1_ref, w2_ref, fb2_ref,
                  gf_ref, bf_ref, wout_ref, bout_ref,
                  o_ref, x_sc, *, n_heads):
    b = pl.program_id(0)
    layer = pl.program_id(1)
    T, C = x_sc.shape
    D = C // n_heads

    # ---------------- embeddings: first layer step only ----------------------
    @pl.when(layer == 0)
    def _():
        V = tok_ref.shape[0]
        S = scaf_ref.shape[0]
        Bn = admet_ref.shape[0]
        # token embedding gather as one-hot @ table (MXU); fine at this V
        cv = lax.broadcasted_iota(jnp.int32, (T, V), 1)
        tok_oh = (cv == idx_ref[...]).astype(jnp.float32)
        x = jnp.dot(tok_oh, tok_ref[...], preferred_element_type=jnp.float32)
        # positional embedding: this block covers exactly rows 0..T of one seq
        x = x + pos_ref[...]
        # per-sequence admet + scaffold embeddings (computed for all B, row b
        # selected with a tiny one-hot matmul -> no dynamic sublane indexing)
        cs = lax.broadcasted_iota(jnp.int32, (Bn, S), 1)
        sc_oh = (cs == sidx_ref[...]).astype(jnp.float32)
        per_b = jnp.dot(sc_oh, scaf_ref[...], preferred_element_type=jnp.float32)
        per_b = per_b + jnp.dot(admet_ref[...], adw_ref[...],
                                preferred_element_type=jnp.float32) + adb_ref[...]
        sel = (lax.broadcasted_iota(jnp.int32, (1, Bn), 1) == b).astype(jnp.float32)
        x = x + jnp.dot(sel, per_b, preferred_element_type=jnp.float32)
        # dropout(0.1) identity in eval mode
        x_sc[...] = x

    # ---------------- one Transformer_Block per (b, layer) step --------------
    x = x_sc[...]                                 # (T, C) resident residual
    scale = 1.0 / math.sqrt(D)
    bias = bias_ref[...]                          # (T, T) additive causal bias

    # -------- attention --------
    h = _layernorm(x, g1_ref[0], be1_ref[0])
    qkv = jnp.dot(h, wqkv_ref[0], preferred_element_type=jnp.float32)  # (T, 3C)
    q = qkv[:, :C]
    k = qkv[:, C:2 * C]
    v = qkv[:, 2 * C:]

    # Head split via lane masks: no per-head lane-offset slices, no y scratch,
    # no masked stores.  Each head contributes p_h @ (v * mask_h) into its own
    # columns of y (exact: contributions outside the head are exact zeros).
    lane = lax.broadcasted_iota(jnp.int32, (1, C), 1)
    y = jnp.zeros((T, C), jnp.float32)
    for hh in range(n_heads):                     # static unroll, small H
        hm = ((lane >= hh * D) & (lane < (hh + 1) * D)).astype(jnp.float32)
        s = lax.dot_general(q, k * hm, (((1,), (1,)), ((), ())),
                            preferred_element_type=jnp.float32) * scale + bias
        p = jnp.exp(s - jnp.max(s, axis=-1, keepdims=True))
        p = p / jnp.sum(p, axis=-1, keepdims=True)      # exact reciprocal
        # dropout on attention weights is identity in eval mode
        y = y + jnp.dot(p, v * hm, preferred_element_type=jnp.float32)

    x = x + jnp.dot(y, wp_ref[0], preferred_element_type=jnp.float32) + bp_ref[0]

    # -------- MLP --------
    h2 = _layernorm(x, g2_ref[0], be2_ref[0])
    m1 = _gelu(jnp.dot(h2, w1_ref[0], preferred_element_type=jnp.float32)
               + fb1_ref[0])
    x = x + jnp.dot(m1, w2_ref[0], preferred_element_type=jnp.float32) + fb2_ref[0]
    x_sc[...] = x

    # ---------------- final LN + logits: last layer step only ----------------
    @pl.when(layer == pl.num_programs(1) - 1)
    def _():
        hf = _layernorm(x, gf_ref[...], bf_ref[...])
        o_ref[...] = (jnp.dot(hf, wout_ref[...], preferred_element_type=jnp.float32)
                      + bout_ref[...]).astype(o_ref.dtype)


# ---------------------------------------------------------------------------
# host-side (outside jit) weight re-layout: transposes, QKV fusion, reshapes
# ---------------------------------------------------------------------------
def prepare_params(params, seq_len):
    L, C, _ = params["wq"].shape
    C4 = 4 * C
    V = params["tok_tbl"].shape[0]
    T = seq_len

    def wt(w):  # (L, out, in) -> (L, in, out) so the kernel computes x @ W
        return jnp.swapaxes(w, -1, -2)

    tril = jnp.tril(jnp.ones((T, T), dtype=bool))
    # TODO(synk): at production scale cast the matmul weights below to bf16
    # (keep preferred_element_type=f32 in the kernel); kept f32 here for exact
    # parity with the PyTorch f32 forward at this toy size.
    return dict(
        tok_tbl=params["tok_tbl"],
        pos=params["pos"][:T],
        adw=params["admet_w"].T,                    # (A, C)
        adb=params["admet_b"].reshape(1, C),
        scaf_tbl=params["scaf_tbl"],
        bias=jnp.where(tril, 0.0, -1e30).astype(jnp.float32),
        ln1_g=params["ln1_g"].reshape(L, 1, C),
        ln1_b=params["ln1_b"].reshape(L, 1, C),
        wqkv=jnp.concatenate([wt(params["wq"]), wt(params["wk"]),
                              wt(params["wv"])], axis=-1),   # (L, C, 3C)
        wp=wt(params["wp"]),
        bp=params["bp"].reshape(L, 1, C),
        ln2_g=params["ln2_g"].reshape(L, 1, C),
        ln2_b=params["ln2_b"].reshape(L, 1, C),
        w1=wt(params["w1"]),                        # (L, C, 4C)
        b1=params["b1"].reshape(L, 1, C4),
        w2=wt(params["w2"]),                        # (L, 4C, C)
        b2=params["b2"].reshape(L, 1, C),
        lnf_g=params["lnf_g"].reshape(1, C),
        lnf_b=params["lnf_b"].reshape(1, C),
        wout=params["wout"].T,                      # (C, V)
        bout=params["bout"].reshape(1, V),
    )


# ---------------------------------------------------------------------------
# wrapper: full Transformer_Model forward (Autoregressive mode, eval)
# ---------------------------------------------------------------------------
def transformer_forward(prepped, idx, admet_props, scaffold_idx, *, n_heads):
    B, T = idx.shape
    C = prepped["pos"].shape[-1]
    V = prepped["tok_tbl"].shape[0]
    L = prepped["wqkv"].shape[0]
    C4 = 4 * C
    BT = B * T
    assert C % n_heads == 0

    idx2 = idx.reshape(BT, 1).astype(jnp.int32)
    sidx = scaffold_idx.reshape(B, 1).astype(jnp.int32)
    admet = admet_props.astype(jnp.float32)

    def fixed2(shape):
        return pl.BlockSpec(shape, lambda b, l: (0, 0))

    def per_layer(shape2):
        return pl.BlockSpec((1,) + shape2, lambda b, l: (l, 0, 0))

    in_specs = [
        pl.BlockSpec((T, 1), lambda b, l: (b, 0)),   # token ids (per batch)
        fixed2(admet.shape),                         # admet props (B, A)
        fixed2((B, 1)),                              # scaffold ids (B, 1)
        fixed2(prepped["tok_tbl"].shape),            # token table (V, C)
        fixed2((T, C)),                              # positional (T, C)
        fixed2(prepped["adw"].shape),                # admet weight (A, C)
        fixed2((1, C)),                              # admet bias
        fixed2(prepped["scaf_tbl"].shape),           # scaffold table (S, C)
        fixed2((T, T)),                              # causal additive bias
        per_layer((1, C)), per_layer((1, C)),        # ln1 gamma / beta
        per_layer((C, 3 * C)),                       # fused QKV weight
        per_layer((C, C)),                           # Wp^T
        per_layer((1, C)),                           # projection bias
        per_layer((1, C)), per_layer((1, C)),        # ln2 gamma / beta
        per_layer((C, C4)), per_layer((1, C4)),      # W1^T, b1
        per_layer((C4, C)), per_layer((1, C)),       # W2^T, b2
        fixed2((1, C)), fixed2((1, C)),              # final LN gamma / beta
        fixed2((C, V)), fixed2((1, V)),              # Wout^T, bout (lane-dense)
    ]

    logits = pl.pallas_call(
        functools.partial(_fused_kernel, n_heads=n_heads),
        out_shape=jax.ShapeDtypeStruct((BT, V), jnp.float32),
        grid_spec=pltpu.PrefetchScalarGridSpec(
            num_scalar_prefetch=0,
            grid=(B, L),                             # batch parallel, layers serial
            in_specs=in_specs,
            out_specs=pl.BlockSpec((T, V), lambda b, l: (b, 0)),
            scratch_shapes=[pltpu.VMEM((T, C), jnp.float32)],  # residual stream
        ),
        compiler_params=pltpu.CompilerParams(
            dimension_semantics=("parallel", "arbitrary")),
    )(idx2, admet, sidx,
      prepped["tok_tbl"], prepped["pos"], prepped["adw"], prepped["adb"],
      prepped["scaf_tbl"], prepped["bias"],
      prepped["ln1_g"], prepped["ln1_b"], prepped["wqkv"], prepped["wp"],
      prepped["bp"], prepped["ln2_g"], prepped["ln2_b"],
      prepped["w1"], prepped["b1"], prepped["w2"], prepped["b2"],
      prepped["lnf_g"], prepped["lnf_b"], prepped["wout"], prepped["bout"])

    return logits.reshape(B, T, V)


# ---------------------------------------------------------------------------
# pure-JAX reference mirroring the PyTorch forward (eval mode)
# ---------------------------------------------------------------------------
def transformer_ref(params, idx, admet_props, scaffold_idx, *, n_heads):
    B, T = idx.shape
    V, C = params["tok_tbl"].shape
    L = params["wq"].shape[0]
    D = C // n_heads

    tok = params["tok_tbl"][idx]
    pos = params["pos"][:T][None]
    admet_e = admet_props @ params["admet_w"].T + params["admet_b"]
    scaf = params["scaf_tbl"][scaffold_idx]
    x = tok + pos + admet_e[:, None, :] + scaf[:, None, :]

    mask = jnp.tril(jnp.ones((T, T), dtype=bool))
    for l in range(L):
        h = _layernorm(x, params["ln1_g"][l], params["ln1_b"][l])
        q = (h @ params["wq"][l].T).reshape(B, T, n_heads, D).transpose(0, 2, 1, 3)
        k = (h @ params["wk"][l].T).reshape(B, T, n_heads, D).transpose(0, 2, 1, 3)
        v = (h @ params["wv"][l].T).reshape(B, T, n_heads, D).transpose(0, 2, 1, 3)
        s = jnp.einsum("bhqd,bhkd->bhqk", q, k) / math.sqrt(D)
        s = jnp.where(mask, s, -jnp.inf)
        p = jax.nn.softmax(s, axis=-1)
        y = jnp.einsum("bhqk,bhkd->bhqd", p, v)
        y = y.transpose(0, 2, 1, 3).reshape(B, T, C)
        x = x + y @ params["wp"][l].T + params["bp"][l]
        h2 = _layernorm(x, params["ln2_g"][l], params["ln2_b"][l])
        m = _gelu(h2 @ params["w1"][l].T + params["b1"][l])
        x = x + m @ params["w2"][l].T + params["b2"][l]
    x = _layernorm(x, params["lnf_g"], params["lnf_b"])
    return x @ params["wout"].T + params["bout"]


# ---------------------------------------------------------------------------
if __name__ == "__main__":
    # Small shapes consistent with the module (Self_Attention default n_heads=8):
    B, T, C, H = 2, 8, 32, 8
    L = 2          # n_layers (model default 8; small for the demo)
    V = 128        # vocab_size (multiple of 128 -> lane-dense logits)
    A = 10         # admet_dim
    S = 64         # num_scaffolds (small for the demo)
    C4 = 4 * C

    key = jax.random.PRNGKey(0)
    keys = iter(jax.random.split(key, 32))

    def unif(k, shape, fan_in):
        b = 1.0 / math.sqrt(fan_in)
        return jax.random.uniform(k, shape, jnp.float32, -b, b)

    params = dict(
        tok_tbl=0.02 * jax.random.normal(next(keys), (V, C), jnp.float32),
        pos=0.02 * jax.random.normal(next(keys), (T, C), jnp.float32),
        admet_w=unif(next(keys), (C, A), A),
        admet_b=unif(next(keys), (C,), A),
        scaf_tbl=0.02 * jax.random.normal(next(keys), (S, C), jnp.float32),
        ln1_g=1.0 + 0.1 * jax.random.normal(next(keys), (L, C), jnp.float32),
        ln1_b=0.1 * jax.random.normal(next(keys), (L, C), jnp.float32),
        wq=unif(next(keys), (L, C, C), C),
        wk=unif(next(keys), (L, C, C), C),
        wv=unif(next(keys), (L, C, C), C),
        wp=unif(next(keys), (L, C, C), C),
        bp=unif(next(keys), (L, C), C),
        ln2_g=1.0 + 0.1 * jax.random.normal(next(keys), (L, C), jnp.float32),
        ln2_b=0.1 * jax.random.normal(next(keys), (L, C), jnp.float32),
        w1=unif(next(keys), (L, C4, C), C),
        b1=unif(next(keys), (L, C4), C),
        w2=unif(next(keys), (L, C, C4), C4),
        b2=unif(next(keys), (L, C), C4),
        lnf_g=1.0 + 0.1 * jax.random.normal(next(keys), (C,), jnp.float32),
        lnf_b=0.1 * jax.random.normal(next(keys), (C,), jnp.float32),
        wout=unif(next(keys), (V, C), C),
        bout=unif(next(keys), (V,), C),
    )

    idx = jax.random.randint(next(keys), (B, T), 0, V)
    admet_props = jax.random.normal(next(keys), (B, A), jnp.float32)
    scaffold_idx = jax.random.randint(next(keys), (B,), 0, S)

    # Weight re-layout done once, outside the jitted forward (review item).
    prepped = prepare_params(params, T)

    fwd = jax.jit(functools.partial(transformer_forward, n_heads=H))
    out = jax.block_until_ready(fwd(prepped, idx, admet_props, scaffold_idx))

    ref = transformer_ref(params, idx, admet_props, scaffold_idx, n_heads=H)

    assert out.shape == (B, T, V), out.shape
    assert jnp.allclose(out, ref, atol=1e-3, rtol=1e-3), (
        "mismatch vs JAX reference: max abs diff "
        f"{float(jnp.max(jnp.abs(out - ref)))}")

    print("KERNEL_OK")
</pallas_src>

<mosaic_0001>
module attributes {stable_mosaic.version = 11 : i64} {
  func.func @_fused_kernel(%arg0: i32, %arg1: i32, %arg2: memref<8x1xi32, #tpu.memory_space<vmem>>, %arg3: memref<2x10xf32, #tpu.memory_space<vmem>>, %arg4: memref<2x1xi32, #tpu.memory_space<vmem>>, %arg5: memref<128x32xf32, #tpu.memory_space<vmem>>, %arg6: memref<8x32xf32, #tpu.memory_space<vmem>>, %arg7: memref<10x32xf32, #tpu.memory_space<vmem>>, %arg8: memref<1x32xf32, #tpu.memory_space<vmem>>, %arg9: memref<64x32xf32, #tpu.memory_space<vmem>>, %arg10: memref<8x8xf32, #tpu.memory_space<vmem>>, %arg11: memref<1x1x32xf32, #tpu.memory_space<vmem>>, %arg12: memref<1x1x32xf32, #tpu.memory_space<vmem>>, %arg13: memref<1x32x96xf32, #tpu.memory_space<vmem>>, %arg14: memref<1x32x32xf32, #tpu.memory_space<vmem>>, %arg15: memref<1x1x32xf32, #tpu.memory_space<vmem>>, %arg16: memref<1x1x32xf32, #tpu.memory_space<vmem>>, %arg17: memref<1x1x32xf32, #tpu.memory_space<vmem>>, %arg18: memref<1x32x128xf32, #tpu.memory_space<vmem>>, %arg19: memref<1x1x128xf32, #tpu.memory_space<vmem>>, %arg20: memref<1x128x32xf32, #tpu.memory_space<vmem>>, %arg21: memref<1x1x32xf32, #tpu.memory_space<vmem>>, %arg22: memref<1x32xf32, #tpu.memory_space<vmem>>, %arg23: memref<1x32xf32, #tpu.memory_space<vmem>>, %arg24: memref<32x128xf32, #tpu.memory_space<vmem>>, %arg25: memref<1x128xf32, #tpu.memory_space<vmem>>, %arg26: memref<8x128xf32, #tpu.memory_space<vmem>>, %arg27: memref<8x32xf32, #tpu.memory_space<vmem>>) attributes {dimension_semantics = [#tpu.dimension_semantics<parallel>, #tpu.dimension_semantics<arbitrary>], iteration_bounds = array<i64: 2, 2>, scalar_prefetch = 0 : i64, scratch_operands = 1 : i64, tpu.core_type = #tpu.core_type<tc>, window_params = [{transform_indices = @transform_0, window_bounds = array<i64: 8, 1>}, {pipeline_mode = #tpu.pipeline_mode<synchronous>, transform_indices = @transform_1, window_bounds = array<i64: 2, 10>}, {pipeline_mode = #tpu.pipeline_mode<synchronous>, transform_indices = @transform_2, window_bounds = array<i64: 2, 1>}, {pipeline_mode = #tpu.pipeline_mode<synchronous>, transform_indices = @transform_3, window_bounds = array<i64: 128, 32>}, {pipeline_mode = #tpu.pipeline_mode<synchronous>, transform_indices = @transform_4, window_bounds = array<i64: 8, 32>}, {pipeline_mode = #tpu.pipeline_mode<synchronous>, transform_indices = @transform_5, window_bounds = array<i64: 10, 32>}, {pipeline_mode = #tpu.pipeline_mode<synchronous>, transform_indices = @transform_6, window_bounds = array<i64: 1, 32>}, {pipeline_mode = #tpu.pipeline_mode<synchronous>, transform_indices = @transform_7, window_bounds = array<i64: 64, 32>}, {pipeline_mode = #tpu.pipeline_mode<synchronous>, transform_indices = @transform_8, window_bounds = array<i64: 8, 8>}, {transform_indices = @transform_9, window_bounds = array<i64: 1, 1, 32>}, {transform_indices = @transform_10, window_bounds = array<i64: 1, 1, 32>}, {transform_indices = @transform_11, window_bounds = array<i64: 1, 32, 96>}, {transform_indices = @transform_12, window_bounds = array<i64: 1, 32, 32>}, {transform_indices = @transform_13, window_bounds = array<i64: 1, 1, 32>}, {transform_indices = @transform_14, window_bounds = array<i64: 1, 1, 32>}, {transform_indices = @transform_15, window_bounds = array<i64: 1, 1, 32>}, {transform_indices = @transform_16, window_bounds = array<i64: 1, 32, 128>}, {transform_indices = @transform_17, window_bounds = array<i64: 1, 1, 128>}, {transform_indices = @transform_18, window_bounds = array<i64: 1, 128, 32>}, {transform_indices = @transform_19, window_bounds = array<i64: 1, 1, 32>}, {pipeline_mode = #tpu.pipeline_mode<synchronous>, transform_indices = @transform_20, window_bounds = array<i64: 1, 32>}, {pipeline_mode = #tpu.pipeline_mode<synchronous>, transform_indices = @transform_21, window_bounds = array<i64: 1, 32>}, {pipeline_mode = #tpu.pipeline_mode<synchronous>, transform_indices = @transform_22, window_bounds = array<i64: 32, 128>}, {pipeline_mode = #tpu.pipeline_mode<synchronous>, transform_indices = @transform_23, window_bounds = array<i64: 1, 128>}, {transform_indices = @transform_24, window_bounds = array<i64: 8, 128>}]} {
    %c0_i32 = arith.constant 0 : i32
    %0 = arith.cmpi eq, %arg1, %c0_i32 : i32
    %1 = arith.extui %0 : i1 to i32
    %c0_i32_0 = arith.constant 0 : i32
    %2 = arith.cmpi ne, %1, %c0_i32_0 : i32
    scf.if %2 {
      %309 = tpu.iota {dimensions = array<i32: 1>} : vector<8x128xi32>
      %c0_106 = arith.constant 0 : index
      %c0_107 = arith.constant 0 : index
      %310 = vector.load %arg2[%c0_106, %c0_107] : memref<8x1xi32, #tpu.memory_space<vmem>>, vector<8x1xi32>
      %311 = vector.broadcast %310 : vector<8x1xi32> to vector<8x128xi32>
      %312 = arith.cmpi eq, %309, %311 : vector<8x128xi32>
      %313 = arith.extui %312 : vector<8x128xi1> to vector<8x128xi32>
      %314 = arith.sitofp %313 : vector<8x128xi32> to vector<8x128xf32>
      %c0_108 = arith.constant 0 : index
      %c0_109 = arith.constant 0 : index
      %315 = vector.load %arg5[%c0_108, %c0_109] : memref<128x32xf32, #tpu.memory_space<vmem>>, vector<128x32xf32>
      %cst_110 = arith.constant dense<0.000000e+00> : vector<8x32xf32>
      %316 = tpu.matmul %314, %315, %cst_110 {dimension_numbers = #tpu.dot_dimension_numbers<[1], [0], [0], [1], [0, 0, 1, 1], [], []>} : vector<8x128xf32>, vector<128x32xf32>, vector<8x32xf32> -> vector<8x32xf32>
      %c0_111 = arith.constant 0 : index
      %c0_112 = arith.constant 0 : index
      %317 = vector.load %arg6[%c0_111, %c0_112] : memref<8x32xf32, #tpu.memory_space<vmem>>, vector<8x32xf32>
      %318 = arith.addf %316, %317 : vector<8x32xf32>
      %319 = tpu.iota {dimensions = array<i32: 1>} : vector<2x64xi32>
      %c0_113 = arith.constant 0 : index
      %c0_114 = arith.constant 0 : index
      %320 = vector.load %arg4[%c0_113, %c0_114] : memref<2x1xi32, #tpu.memory_space<vmem>>, vector<2x1xi32>
      %321 = vector.broadcast %320 : vector<2x1xi32> to vector<2x64xi32>
      %322 = arith.cmpi eq, %319, %321 : vector<2x64xi32>
      %323 = arith.extui %322 : vector<2x64xi1> to vector<2x64xi32>
      %324 = arith.sitofp %323 : vector<2x64xi32> to vector<2x64xf32>
      %c0_115 = arith.constant 0 : index
      %c0_116 = arith.constant 0 : index
      %325 = vector.load %arg9[%c0_115, %c0_116] : memref<64x32xf32, #tpu.memory_space<vmem>>, vector<64x32xf32>
      %cst_117 = arith.constant dense<0.000000e+00> : vector<2x32xf32>
      %326 = tpu.matmul %324, %325, %cst_117 {dimension_numbers = #tpu.dot_dimension_numbers<[1], [0], [0], [1], [0, 0, 1, 1], [], []>} : vector<2x64xf32>, vector<64x32xf32>, vector<2x32xf32> -> vector<2x32xf32>
      %c0_118 = arith.constant 0 : index
      %c0_119 = arith.constant 0 : index
      %327 = vector.load %arg3[%c0_118, %c0_119] : memref<2x10xf32, #tpu.memory_space<vmem>>, vector<2x10xf32>
      %c0_120 = arith.constant 0 : index
      %c0_121 = arith.constant 0 : index
      %328 = vector.load %arg7[%c0_120, %c0_121] : memref<10x32xf32, #tpu.memory_space<vmem>>, vector<10x32xf32>
      %cst_122 = arith.constant dense<0.000000e+00> : vector<2x32xf32>
      %329 = tpu.matmul %327, %328, %cst_122 {dimension_numbers = #tpu.dot_dimension_numbers<[1], [0], [0], [1], [0, 0, 1, 1], [], []>} : vector<2x10xf32>, vector<10x32xf32>, vector<2x32xf32> -> vector<2x32xf32>
      %330 = arith.addf %326, %329 : vector<2x32xf32>
      %c0_123 = arith.constant 0 : index
      %c0_124 = arith.constant 0 : index
      %331 = vector.load %arg8[%c0_123, %c0_124] : memref<1x32xf32, #tpu.memory_space<vmem>>, vector<1x32xf32>
      %332 = vector.broadcast %331 : vector<1x32xf32> to vector<2x32xf32>
      %333 = arith.addf %330, %332 : vector<2x32xf32>
      %334 = tpu.iota {dimensions = array<i32: 1>} : vector<1x2xi32>
      %335 = vector.broadcast %arg0 : i32 to vector<1x2xi32>
      %336 = arith.cmpi eq, %334, %335 : vector<1x2xi32>
      %337 = arith.extui %336 : vector<1x2xi1> to vector<1x2xi32>
      %338 = arith.sitofp %337 : vector<1x2xi32> to vector<1x2xf32>
      %cst_125 = arith.constant dense<0.000000e+00> : vector<1x32xf32>
      %339 = tpu.matmul %338, %333, %cst_125 {dimension_numbers = #tpu.dot_dimension_numbers<[1], [0], [0], [1], [0, 0, 1, 1], [], []>} : vector<1x2xf32>, vector<2x32xf32>, vector<1x32xf32> -> vector<1x32xf32>
      %340 = vector.broadcast %339 : vector<1x32xf32> to vector<8x32xf32>
      %341 = arith.addf %318, %340 : vector<8x32xf32>
      %c0_126 = arith.constant 0 : index
      %c0_127 = arith.constant 0 : index
      %342 = vector.load %arg27[%c0_126, %c0_127] : memref<8x32xf32, #tpu.memory_space<vmem>>, vector<8x32xf32>
      tpu.vector_store %arg27[%c0_126, %c0_127], %341 {strides = array<i32>} : memref<8x32xf32, #tpu.memory_space<vmem>>, vector<8x32xf32>,
    } else {
    }
    %c0 = arith.constant 0 : index
    %c0_1 = arith.constant 0 : index
    %3 = vector.load %arg27[%c0, %c0_1] : memref<8x32xf32, #tpu.memory_space<vmem>>, vector<8x32xf32>
    %c0_2 = arith.constant 0 : index
    %c0_3 = arith.constant 0 : index
    %4 = vector.load %arg10[%c0_2, %c0_3] : memref<8x8xf32, #tpu.memory_space<vmem>>, vector<8x8xf32>
    %c0_4 = arith.constant 0 : index
    %c0_5 = arith.constant 0 : index
    %c0_6 = arith.constant 0 : index
    %5 = vector.load %arg11[%c0_4, %c0_5, %c0_6] : memref<1x1x32xf32, #tpu.memory_space<vmem>>, vector<1x1x32xf32>
    %6 = vector.shape_cast %5 : vector<1x1x32xf32> to vector<1x32xf32>
    %c0_7 = arith.constant 0 : index
    %c0_8 = arith.constant 0 : index
    %c0_9 = arith.constant 0 : index
    %7 = vector.load %arg12[%c0_7, %c0_8, %c0_9] : memref<1x1x32xf32, #tpu.memory_space<vmem>>, vector<1x1x32xf32>
    %8 = vector.shape_cast %7 : vector<1x1x32xf32> to vector<1x32xf32>
    %cst = arith.constant dense<0.000000e+00> : vector<8xf32>
    %9 = vector.multi_reduction <add>, %3, %cst [1] : vector<8x32xf32> to vector<8xf32>
    %10 = vector.shape_cast %9 : vector<8xf32> to vector<8x1xf32>
    %cst_10 = arith.constant 3.200000e+01 : f32
    %11 = vector.broadcast %cst_10 : f32 to vector<8x1xf32>
    %12 = arith.divf %10, %11 : vector<8x1xf32>
    %13 = vector.broadcast %12 : vector<8x1xf32> to vector<8x32xf32>
    %14 = arith.subf %3, %13 : vector<8x32xf32>
    %15 = arith.mulf %14, %14 : vector<8x32xf32>
    %cst_11 = arith.constant dense<0.000000e+00> : vector<8xf32>
    %16 = vector.multi_reduction <add>, %15, %cst_11 [1] : vector<8x32xf32> to vector<8xf32>
    %17 = vector.shape_cast %16 : vector<8xf32> to vector<8x1xf32>
    %cst_12 = arith.constant 3.200000e+01 : f32
    %18 = vector.broadcast %cst_12 : f32 to vector<8x1xf32>
    %19 = arith.divf %17, %18 : vector<8x1xf32>
    %cst_13 = arith.constant 9.99999974E-6 : f32
    %20 = vector.broadcast %cst_13 : f32 to vector<8x1xf32>
    %21 = arith.addf %19, %20 : vector<8x1xf32>
    %22 = math.sqrt %21 : vector<8x1xf32>
    %23 = vector.broadcast %22 : vector<8x1xf32> to vector<8x32xf32>
    %24 = arith.divf %14, %23 : vector<8x32xf32>
    %25 = vector.broadcast %6 : vector<1x32xf32> to vector<8x32xf32>
    %26 = arith.mulf %24, %25 : vector<8x32xf32>
    %27 = vector.broadcast %8 : vector<1x32xf32> to vector<8x32xf32>
    %28 = arith.addf %26, %27 : vector<8x32xf32>
    %c0_14 = arith.constant 0 : index
    %c0_15 = arith.constant 0 : index
    %c0_16 = arith.constant 0 : index
    %29 = vector.load %arg13[%c0_14, %c0_15, %c0_16] : memref<1x32x96xf32, #tpu.memory_space<vmem>>, vector<1x32x96xf32>
    %30 = vector.shape_cast %29 : vector<1x32x96xf32> to vector<32x96xf32>
    %cst_17 = arith.constant dense<0.000000e+00> : vector<8x96xf32>
    %31 = tpu.matmul %28, %30, %cst_17 {dimension_numbers = #tpu.dot_dimension_numbers<[1], [0], [0], [1], [0, 0, 1, 1], [], []>} : vector<8x32xf32>, vector<32x96xf32>, vector<8x96xf32> -> vector<8x96xf32>
    %32 = vector.extract_strided_slice %31 {offsets = [0, 0], sizes = [8, 32], strides = [1, 1]} : vector<8x96xf32> to vector<8x32xf32>
    %33 = vector.extract_strided_slice %31 {offsets = [0, 32], sizes = [8, 32], strides = [1, 1]} : vector<8x96xf32> to vector<8x32xf32>
    %34 = vector.extract_strided_slice %31 {offsets = [0, 64], sizes = [8, 32], strides = [1, 1]} : vector<8x96xf32> to vector<8x32xf32>
    %35 = tpu.iota {dimensions = array<i32: 1>} : vector<1x32xi32>
    %cst_18 = arith.constant 0.000000e+00 : f32
    %36 = vector.broadcast %cst_18 : f32 to vector<8x32xf32>
    %c0_i32_19 = arith.constant 0 : i32
    %37 = vector.broadcast %c0_i32_19 : i32 to vector<1x32xi32>
    %38 = arith.cmpi sge, %35, %37 : vector<1x32xi32>
    %c4_i32 = arith.constant 4 : i32
    %39 = vector.broadcast %c4_i32 : i32 to vector<1x32xi32>
    %40 = arith.cmpi slt, %35, %39 : vector<1x32xi32>
    %41 = arith.andi %38, %40 : vector<1x32xi1>
    %42 = arith.extui %41 : vector<1x32xi1> to vector<1x32xi32>
    %43 = arith.sitofp %42 : vector<1x32xi32> to vector<1x32xf32>
    %44 = vector.broadcast %43 : vector<1x32xf32> to vector<8x32xf32>
    %45 = arith.mulf %33, %44 : vector<8x32xf32>
    %cst_20 = arith.constant dense<0.000000e+00> : vector<8x8xf32>
    %46 = tpu.matmul %32, %45, %cst_20 {dimension_numbers = #tpu.dot_dimension_numbers<[1], [1], [0], [0], [0, 0, 1, 0], [], []>} : vector<8x32xf32>, vector<8x32xf32>, vector<8x8xf32> -> vector<8x8xf32>
    %cst_21 = arith.constant 5.000000e-01 : f32
    %47 = vector.broadcast %cst_21 : f32 to vector<8x8xf32>
    %48 = arith.mulf %46, %47 : vector<8x8xf32>
    %49 = arith.addf %48, %4 : vector<8x8xf32>
    %cst_22 = arith.constant dense<0xFF800000> : vector<8xf32>
    %50 = vector.multi_reduction <maximumf>, %49, %cst_22 [1] : vector<8x8xf32> to vector<8xf32>
    %51 = vector.shape_cast %50 : vector<8xf32> to vector<8x1xf32>
    %52 = vector.broadcast %51 : vector<8x1xf32> to vector<8x8xf32>
    %53 = arith.subf %49, %52 : vector<8x8xf32>
    %54 = math.exp %53 : vector<8x8xf32>
    %cst_23 = arith.constant dense<0.000000e+00> : vector<8xf32>
    %55 = vector.multi_reduction <add>, %54, %cst_23 [1] : vector<8x8xf32> to vector<8xf32>
    %56 = vector.shape_cast %55 : vector<8xf32> to vector<8x1xf32>
    %57 = vector.broadcast %56 : vector<8x1xf32> to vector<8x8xf32>
    %58 = arith.divf %54, %57 : vector<8x8xf32>
    %59 = vector.broadcast %43 : vector<1x32xf32> to vector<8x32xf32>
    %60 = arith.mulf %34, %59 : vector<8x32xf32>
    %cst_24 = arith.constant dense<0.000000e+00> : vector<8x32xf32>
    %61 = tpu.matmul %58, %60, %cst_24 {dimension_numbers = #tpu.dot_dimension_numbers<[1], [0], [0], [1], [0, 0, 1, 1], [], []>} : vector<8x8xf32>, vector<8x32xf32>, vector<8x32xf32> -> vector<8x32xf32>
    %62 = arith.addf %36, %61 : vector<8x32xf32>
    %c4_i32_25 = arith.constant 4 : i32
    %63 = vector.broadcast %c4_i32_25 : i32 to vector<1x32xi32>
    %64 = arith.cmpi sge, %35, %63 : vector<1x32xi32>
    %c8_i32 = arith.constant 8 : i32
    %65 = vector.broadcast %c8_i32 : i32 to vector<1x32xi32>
    %66 = arith.cmpi slt, %35, %65 : vector<1x32xi32>
    %67 = arith.andi %64, %66 : vector<1x32xi1>
    %68 = arith.extui %67 : vector<1x32xi1> to vector<1x32xi32>
    %69 = arith.sitofp %68 : vector<1x32xi32> to vector<1x32xf32>
    %70 = vector.broadcast %69 : vector<1x32xf32> to vector<8x32xf32>
    %71 = arith.mulf %33, %70 : vector<8x32xf32>
    %cst_26 = arith.constant dense<0.000000e+00> : vector<8x8xf32>
    %72 = tpu.matmul %32, %71, %cst_26 {dimension_numbers = #tpu.dot_dimension_numbers<[1], [1], [0], [0], [0, 0, 1, 0], [], []>} : vector<8x32xf32>, vector<8x32xf32>, vector<8x8xf32> -> vector<8x8xf32>
    %cst_27 = arith.constant 5.000000e-01 : f32
    %73 = vector.broadcast %cst_27 : f32 to vector<8x8xf32>
    %74 = arith.mulf %72, %73 : vector<8x8xf32>
    %75 = arith.addf %74, %4 : vector<8x8xf32>
    %cst_28 = arith.constant dense<0xFF800000> : vector<8xf32>
    %76 = vector.multi_reduction <maximumf>, %75, %cst_28 [1] : vector<8x8xf32> to vector<8xf32>
    %77 = vector.shape_cast %76 : vector<8xf32> to vector<8x1xf32>
    %78 = vector.broadcast %77 : vector<8x1xf32> to vector<8x8xf32>
    %79 = arith.subf %75, %78 : vector<8x8xf32>
    %80 = math.exp %79 : vector<8x8xf32>
    %cst_29 = arith.constant dense<0.000000e+00> : vector<8xf32>
    %81 = vector.multi_reduction <add>, %80, %cst_29 [1] : vector<8x8xf32> to vector<8xf32>
    %82 = vector.shape_cast %81 : vector<8xf32> to vector<8x1xf32>
    %83 = vector.broadcast %82 : vector<8x1xf32> to vector<8x8xf32>
    %84 = arith.divf %80, %83 : vector<8x8xf32>
    %85 = vector.broadcast %69 : vector<1x32xf32> to vector<8x32xf32>
    %86 = arith.mulf %34, %85 : vector<8x32xf32>
    %cst_30 = arith.constant dense<0.000000e+00> : vector<8x32xf32>
    %87 = tpu.matmul %84, %86, %cst_30 {dimension_numbers = #tpu.dot_dimension_numbers<[1], [0], [0], [1], [0, 0, 1, 1], [], []>} : vector<8x8xf32>, vector<8x32xf32>, vector<8x32xf32> -> vector<8x32xf32>
    %88 = arith.addf %62, %87 : vector<8x32xf32>
    %c8_i32_31 = arith.constant 8 : i32
    %89 = vector.broadcast %c8_i32_31 : i32 to vector<1x32xi32>
    %90 = arith.cmpi sge, %35, %89 : vector<1x32xi32>
    %c12_i32 = arith.constant 12 : i32
    %91 = vector.broadcast %c12_i32 : i32 to vector<1x32xi32>
    %92 = arith.cmpi slt, %35, %91 : vector<1x32xi32>
    %93 = arith.andi %90, %92 : vector<1x32xi1>
    %94 = arith.extui %93 : vector<1x32xi1> to vector<1x32xi32>
    %95 = arith.sitofp %94 : vector<1x32xi32> to vector<1x32xf32>
    %96 = vector.broadcast %95 : vector<1x32xf32> to vector<8x32xf32>
    %97 = arith.mulf %33, %96 : vector<8x32xf32>
    %cst_32 = arith.constant dense<0.000000e+00> : vector<8x8xf32>
    %98 = tpu.matmul %32, %97, %cst_32 {dimension_numbers = #tpu.dot_dimension_numbers<[1], [1], [0], [0], [0, 0, 1, 0], [], []>} : vector<8x32xf32>, vector<8x32xf32>, vector<8x8xf32> -> vector<8x8xf32>
    %cst_33 = arith.constant 5.000000e-01 : f32
    %99 = vector.broadcast %cst_33 : f32 to vector<8x8xf32>
    %100 = arith.mulf %98, %99 : vector<8x8xf32>
    %101 = arith.addf %100, %4 : vector<8x8xf32>
    %cst_34 = arith.constant dense<0xFF800000> : vector<8xf32>
    %102 = vector.multi_reduction <maximumf>, %101, %cst_34 [1] : vector<8x8xf32> to vector<8xf32>
    %103 = vector.shape_cast %102 : vector<8xf32> to vector<8x1xf32>
    %104 = vector.broadcast %103 : vector<8x1xf32> to vector<8x8xf32>
    %105 = arith.subf %101, %104 : vector<8x8xf32>
    %106 = math.exp %105 : vector<8x8xf32>
    %cst_35 = arith.constant dense<0.000000e+00> : vector<8xf32>
    %107 = vector.multi_reduction <add>, %106, %cst_35 [1] : vector<8x8xf32> to vector<8xf32>
    %108 = vector.shape_cast %107 : vector<8xf32> to vector<8x1xf32>
    %109 = vector.broadcast %108 : vector<8x1xf32> to vector<8x8xf32>
    %110 = arith.divf %106, %109 : vector<8x8xf32>
    %111 = vector.broadcast %95 : vector<1x32xf32> to vector<8x32xf32>
    %112 = arith.mulf %34, %111 : vector<8x32xf32>
    %cst_36 = arith.constant dense<0.000000e+00> : vector<8x32xf32>
    %113 = tpu.matmul %110, %112, %cst_36 {dimension_numbers = #tpu.dot_dimension_numbers<[1], [0], [0], [1], [0, 0, 1, 1], [], []>} : vector<8x8xf32>, vector<8x32xf32>, vector<8x32xf32> -> vector<8x32xf32>
    %114 = arith.addf %88, %113 : vector<8x32xf32>
    %c12_i32_37 = arith.constant 12 : i32
    %115 = vector.broadcast %c12_i32_37 : i32 to vector<1x32xi32>
    %116 = arith.cmpi sge, %35, %115 : vector<1x32xi32>
    %c16_i32 = arith.constant 16 : i32
    %117 = vector.broadcast %c16_i32 : i32 to vector<1x32xi32>
    %118 = arith.cmpi slt, %35, %117 : vector<1x32xi32>
    %119 = arith.andi %116, %118 : vector<1x32xi1>
    %120 = arith.extui %119 : vector<1x32xi1> to vector<1x32xi32>
    %121 = arith.sitofp %120 : vector<1x32xi32> to vector<1x32xf32>
    %122 = vector.broadcast %121 : vector<1x32xf32> to vector<8x32xf32>
    %123 = arith.mulf %33, %122 : vector<8x32xf32>
    %cst_38 = arith.constant dense<0.000000e+00> : vector<8x8xf32>
    %124 = tpu.matmul %32, %123, %cst_38 {dimension_numbers = #tpu.dot_dimension_numbers<[1], [1], [0], [0], [0, 0, 1, 0], [], []>} : vector<8x32xf32>, vector<8x32xf32>, vector<8x8xf32> -> vector<8x8xf32>
    %cst_39 = arith.constant 5.000000e-01 : f32
    %125 = vector.broadcast %cst_39 : f32 to vector<8x8xf32>
    %126 = arith.mulf %124, %125 : vector<8x8xf32>
    %127 = arith.addf %126, %4 : vector<8x8xf32>
    %cst_40 = arith.constant dense<0xFF800000> : vector<8xf32>
    %128 = vector.multi_reduction <maximumf>, %127, %cst_40 [1] : vector<8x8xf32> to vector<8xf32>
    %129 = vector.shape_cast %128 : vector<8xf32> to vector<8x1xf32>
    %130 = vector.broadcast %129 : vector<8x1xf32> to vector<8x8xf32>
    %131 = arith.subf %127, %130 : vector<8x8xf32>
    %132 = math.exp %131 : vector<8x8xf32>
    %cst_41 = arith.constant dense<0.000000e+00> : vector<8xf32>
    %133 = vector.multi_reduction <add>, %132, %cst_41 [1] : vector<8x8xf32> to vector<8xf32>
    %134 = vector.shape_cast %133 : vector<8xf32> to vector<8x1xf32>
    %135 = vector.broadcast %134 : vector<8x1xf32> to vector<8x8xf32>
    %136 = arith.divf %132, %135 : vector<8x8xf32>
    %137 = vector.broadcast %121 : vector<1x32xf32> to vector<8x32xf32>
    %138 = arith.mulf %34, %137 : vector<8x32xf32>
    %cst_42 = arith.constant dense<0.000000e+00> : vector<8x32xf32>
    %139 = tpu.matmul %136, %138, %cst_42 {dimension_numbers = #tpu.dot_dimension_numbers<[1], [0], [0], [1], [0, 0, 1, 1], [], []>} : vector<8x8xf32>, vector<8x32xf32>, vector<8x32xf32> -> vector<8x32xf32>
    %140 = arith.addf %114, %139 : vector<8x32xf32>
    %c16_i32_43 = arith.constant 16 : i32
    %141 = vector.broadcast %c16_i32_43 : i32 to vector<1x32xi32>
    %142 = arith.cmpi sge, %35, %141 : vector<1x32xi32>
    %c20_i32 = arith.constant 20 : i32
    %143 = vector.broadcast %c20_i32 : i32 to vector<1x32xi32>
    %144 = arith.cmpi slt, %35, %143 : vector<1x32xi32>
    %145 = arith.andi %142, %144 : vector<1x32xi1>
    %146 = arith.extui %145 : vector<1x32xi1> to vector<1x32xi32>
    %147 = arith.sitofp %146 : vector<1x32xi32> to vector<1x32xf32>
    %148 = vector.broadcast %147 : vector<1x32xf32> to vector<8x32xf32>
    %149 = arith.mulf %33, %148 : vector<8x32xf32>
    %cst_44 = arith.constant dense<0.000000e+00> : vector<8x8xf32>
    %150 = tpu.matmul %32, %149, %cst_44 {dimension_numbers = #tpu.dot_dimension_numbers<[1], [1], [0], [0], [0, 0, 1, 0], [], []>} : vector<8x32xf32>, vector<8x32xf32>, vector<8x8xf32> -> vector<8x8xf32>
    %cst_45 = arith.constant 5.000000e-01 : f32
    %151 = vector.broadcast %cst_45 : f32 to vector<8x8xf32>
    %152 = arith.mulf %150, %151 : vector<8x8xf32>
    %153 = arith.addf %152, %4 : vector<8x8xf32>
    %cst_46 = arith.constant dense<0xFF800000> : vector<8xf32>
    %154 = vector.multi_reduction <maximumf>, %153, %cst_46 [1] : vector<8x8xf32> to vector<8xf32>
    %155 = vector.shape_cast %154 : vector<8xf32> to vector<8x1xf32>
    %156 = vector.broadcast %155 : vector<8x1xf32> to vector<8x8xf32>
    %157 = arith.subf %153, %156 : vector<8x8xf32>
    %158 = math.exp %157 : vector<8x8xf32>
    %cst_47 = arith.constant dense<0.000000e+00> : vector<8xf32>
    %159 = vector.multi_reduction <add>, %158, %cst_47 [1] : vector<8x8xf32> to vector<8xf32>
    %160 = vector.shape_cast %159 : vector<8xf32> to vector<8x1xf32>
    %161 = vector.broadcast %160 : vector<8x1xf32> to vector<8x8xf32>
    %162 = arith.divf %158, %161 : vector<8x8xf32>
    %163 = vector.broadcast %147 : vector<1x32xf32> to vector<8x32xf32>
    %164 = arith.mulf %34, %163 : vector<8x32xf32>
    %cst_48 = arith.constant dense<0.000000e+00> : vector<8x32xf32>
    %165 = tpu.matmul %162, %164, %cst_48 {dimension_numbers = #tpu.dot_dimension_numbers<[1], [0], [0], [1], [0, 0, 1, 1], [], []>} : vector<8x8xf32>, vector<8x32xf32>, vector<8x32xf32> -> vector<8x32xf32>
    %166 = arith.addf %140, %165 : vector<8x32xf32>
    %c20_i32_49 = arith.constant 20 : i32
    %167 = vector.broadcast %c20_i32_49 : i32 to vector<1x32xi32>
    %168 = arith.cmpi sge, %35, %167 : vector<1x32xi32>
    %c24_i32 = arith.constant 24 : i32
    %169 = vector.broadcast %c24_i32 : i32 to vector<1x32xi32>
    %170 = arith.cmpi slt, %35, %169 : vector<1x32xi32>
    %171 = arith.andi %168, %170 : vector<1x32xi1>
    %172 = arith.extui %171 : vector<1x32xi1> to vector<1x32xi32>
    %173 = arith.sitofp %172 : vector<1x32xi32> to vector<1x32xf32>
    %174 = vector.broadcast %173 : vector<1x32xf32> to vector<8x32xf32>
    %175 = arith.mulf %33, %174 : vector<8x32xf32>
    %cst_50 = arith.constant dense<0.000000e+00> : vector<8x8xf32>
    %176 = tpu.matmul %32, %175, %cst_50 {dimension_numbers = #tpu.dot_dimension_numbers<[1], [1], [0], [0], [0, 0, 1, 0], [], []>} : vector<8x32xf32>, vector<8x32xf32>, vector<8x8xf32> -> vector<8x8xf32>
    %cst_51 = arith.constant 5.000000e-01 : f32
    %177 = vector.broadcast %cst_51 : f32 to vector<8x8xf32>
    %178 = arith.mulf %176, %177 : vector<8x8xf32>
    %179 = arith.addf %178, %4 : vector<8x8xf32>
    %cst_52 = arith.constant dense<0xFF800000> : vector<8xf32>
    %180 = vector.multi_reduction <maximumf>, %179, %cst_52 [1] : vector<8x8xf32> to vector<8xf32>
    %181 = vector.shape_cast %180 : vector<8xf32> to vector<8x1xf32>
    %182 = vector.broadcast %181 : vector<8x1xf32> to vector<8x8xf32>
    %183 = arith.subf %179, %182 : vector<8x8xf32>
    %184 = math.exp %183 : vector<8x8xf32>
    %cst_53 = arith.constant dense<0.000000e+00> : vector<8xf32>
    %185 = vector.multi_reduction <add>, %184, %cst_53 [1] : vector<8x8xf32> to vector<8xf32>
    %186 = vector.shape_cast %185 : vector<8xf32> to vector<8x1xf32>
    %187 = vector.broadcast %186 : vector<8x1xf32> to vector<8x8xf32>
    %188 = arith.divf %184, %187 : vector<8x8xf32>
    %189 = vector.broadcast %173 : vector<1x32xf32> to vector<8x32xf32>
    %190 = arith.mulf %34, %189 : vector<8x32xf32>
    %cst_54 = arith.constant dense<0.000000e+00> : vector<8x32xf32>
    %191 = tpu.matmul %188, %190, %cst_54 {dimension_numbers = #tpu.dot_dimension_numbers<[1], [0], [0], [1], [0, 0, 1, 1], [], []>} : vector<8x8xf32>, vector<8x32xf32>, vector<8x32xf32> -> vector<8x32xf32>
    %192 = arith.addf %166, %191 : vector<8x32xf32>
    %c24_i32_55 = arith.constant 24 : i32
    %193 = vector.broadcast %c24_i32_55 : i32 to vector<1x32xi32>
    %194 = arith.cmpi sge, %35, %193 : vector<1x32xi32>
    %c28_i32 = arith.constant 28 : i32
    %195 = vector.broadcast %c28_i32 : i32 to vector<1x32xi32>
    %196 = arith.cmpi slt, %35, %195 : vector<1x32xi32>
    %197 = arith.andi %194, %196 : vector<1x32xi1>
    %198 = arith.extui %197 : vector<1x32xi1> to vector<1x32xi32>
    %199 = arith.sitofp %198 : vector<1x32xi32> to vector<1x32xf32>
    %200 = vector.broadcast %199 : vector<1x32xf32> to vector<8x32xf32>
    %201 = arith.mulf %33, %200 : vector<8x32xf32>
    %cst_56 = arith.constant dense<0.000000e+00> : vector<8x8xf32>
    %202 = tpu.matmul %32, %201, %cst_56 {dimension_numbers = #tpu.dot_dimension_numbers<[1], [1], [0], [0], [0, 0, 1, 0], [], []>} : vector<8x32xf32>, vector<8x32xf32>, vector<8x8xf32> -> vector<8x8xf32>
    %cst_57 = arith.constant 5.000000e-01 : f32
    %203 = vector.broadcast %cst_57 : f32 to vector<8x8xf32>
    %204 = arith.mulf %202, %203 : vector<8x8xf32>
    %205 = arith.addf %204, %4 : vector<8x8xf32>
    %cst_58 = arith.constant dense<0xFF800000> : vector<8xf32>
    %206 = vector.multi_reduction <maximumf>, %205, %cst_58 [1] : vector<8x8xf32> to vector<8xf32>
    %207 = vector.shape_cast %206 : vector<8xf32> to vector<8x1xf32>
    %208 = vector.broadcast %207 : vector<8x1xf32> to vector<8x8xf32>
    %209 = arith.subf %205, %208 : vector<8x8xf32>
    %210 = math.exp %209 : vector<8x8xf32>
    %cst_59 = arith.constant dense<0.000000e+00> : vector<8xf32>
    %211 = vector.multi_reduction <add>, %210, %cst_59 [1] : vector<8x8xf32> to vector<8xf32>
    %212 = vector.shape_cast %211 : vector<8xf32> to vector<8x1xf32>
    %213 = vector.broadcast %212 : vector<8x1xf32> to vector<8x8xf32>
    %214 = arith.divf %210, %213 : vector<8x8xf32>
    %215 = vector.broadcast %199 : vector<1x32xf32> to vector<8x32xf32>
    %216 = arith.mulf %34, %215 : vector<8x32xf32>
    %cst_60 = arith.constant dense<0.000000e+00> : vector<8x32xf32>
    %217 = tpu.matmul %214, %216, %cst_60 {dimension_numbers = #tpu.dot_dimension_numbers<[1], [0], [0], [1], [0, 0, 1, 1], [], []>} : vector<8x8xf32>, vector<8x32xf32>, vector<8x32xf32> -> vector<8x32xf32>
    %218 = arith.addf %192, %217 : vector<8x32xf32>
    %c28_i32_61 = arith.constant 28 : i32
    %219 = vector.broadcast %c28_i32_61 : i32 to vector<1x32xi32>
    %220 = arith.cmpi sge, %35, %219 : vector<1x32xi32>
    %c32_i32 = arith.constant 32 : i32
    %221 = vector.broadcast %c32_i32 : i32 to vector<1x32xi32>
    %222 = arith.cmpi slt, %35, %221 : vector<1x32xi32>
    %223 = arith.andi %220, %222 : vector<1x32xi1>
    %224 = arith.extui %223 : vector<1x32xi1> to vector<1x32xi32>
    %225 = arith.sitofp %224 : vector<1x32xi32> to vector<1x32xf32>
    %226 = vector.broadcast %225 : vector<1x32xf32> to vector<8x32xf32>
    %227 = arith.mulf %33, %226 : vector<8x32xf32>
    %cst_62 = arith.constant dense<0.000000e+00> : vector<8x8xf32>
    %228 = tpu.matmul %32, %227, %cst_62 {dimension_numbers = #tpu.dot_dimension_numbers<[1], [1], [0], [0], [0, 0, 1, 0], [], []>} : vector<8x32xf32>, vector<8x32xf32>, vector<8x8xf32> -> vector<8x8xf32>
    %cst_63 = arith.constant 5.000000e-01 : f32
    %229 = vector.broadcast %cst_63 : f32 to vector<8x8xf32>
    %230 = arith.mulf %228, %229 : vector<8x8xf32>
    %231 = arith.addf %230, %4 : vector<8x8xf32>
    %cst_64 = arith.constant dense<0xFF800000> : vector<8xf32>
    %232 = vector.multi_reduction <maximumf>, %231, %cst_64 [1] : vector<8x8xf32> to vector<8xf32>
    %233 = vector.shape_cast %232 : vector<8xf32> to vector<8x1xf32>
    %234 = vector.broadcast %233 : vector<8x1xf32> to vector<8x8xf32>
    %235 = arith.subf %231, %234 : vector<8x8xf32>
    %236 = math.exp %235 : vector<8x8xf32>
    %cst_65 = arith.constant dense<0.000000e+00> : vector<8xf32>
    %237 = vector.multi_reduction <add>, %236, %cst_65 [1] : vector<8x8xf32> to vector<8xf32>
    %238 = vector.shape_cast %237 : vector<8xf32> to vector<8x1xf32>
    %239 = vector.broadcast %238 : vector<8x1xf32> to vector<8x8xf32>
    %240 = arith.divf %236, %239 : vector<8x8xf32>
    %241 = vector.broadcast %225 : vector<1x32xf32> to vector<8x32xf32>
    %242 = arith.mulf %34, %241 : vector<8x32xf32>
    %cst_66 = arith.constant dense<0.000000e+00> : vector<8x32xf32>
    %243 = tpu.matmul %240, %242, %cst_66 {dimension_numbers = #tpu.dot_dimension_numbers<[1], [0], [0], [1], [0, 0, 1, 1], [], []>} : vector<8x8xf32>, vector<8x32xf32>, vector<8x32xf32> -> vector<8x32xf32>
    %244 = arith.addf %218, %243 : vector<8x32xf32>
    %c0_67 = arith.constant 0 : index
    %c0_68 = arith.constant 0 : index
    %c0_69 = arith.constant 0 : index
    %245 = vector.load %arg14[%c0_67, %c0_68, %c0_69] : memref<1x32x32xf32, #tpu.memory_space<vmem>>, vector<1x32x32xf32>
    %246 = vector.shape_cast %245 : vector<1x32x32xf32> to vector<32x32xf32>
    %cst_70 = arith.constant dense<0.000000e+00> : vector<8x32xf32>
    %247 = tpu.matmul %244, %246, %cst_70 {dimension_numbers = #tpu.dot_dimension_numbers<[1], [0], [0], [1], [0, 0, 1, 1], [], []>} : vector<8x32xf32>, vector<32x32xf32>, vector<8x32xf32> -> vector<8x32xf32>
    %248 = arith.addf %3, %247 : vector<8x32xf32>
    %c0_71 = arith.constant 0 : index
    %c0_72 = arith.constant 0 : index
    %c0_73 = arith.constant 0 : index
    %249 = vector.load %arg15[%c0_71, %c0_72, %c0_73] : memref<1x1x32xf32, #tpu.memory_space<vmem>>, vector<1x1x32xf32>
    %250 = vector.shape_cast %249 : vector<1x1x32xf32> to vector<1x32xf32>
    %251 = vector.broadcast %250 : vector<1x32xf32> to vector<8x32xf32>
    %252 = arith.addf %248, %251 : vector<8x32xf32>
    %c0_74 = arith.constant 0 : index
    %c0_75 = arith.constant 0 : index
    %c0_76 = arith.constant 0 : index
    %253 = vector.load %arg16[%c0_74, %c0_75, %c0_76] : memref<1x1x32xf32, #tpu.memory_space<vmem>>, vector<1x1x32xf32>
    %254 = vector.shape_cast %253 : vector<1x1x32xf32> to vector<1x32xf32>
    %c0_77 = arith.constant 0 : index
    %c0_78 = arith.constant 0 : index
    %c0_79 = arith.constant 0 : index
    %255 = vector.load %arg17[%c0_77, %c0_78, %c0_79] : memref<1x1x32xf32, #tpu.memory_space<vmem>>, vector<1x1x32xf32>
    %256 = vector.shape_cast %255 : vector<1x1x32xf32> to vector<1x32xf32>
    %cst_80 = arith.constant dense<0.000000e+00> : vector<8xf32>
    %257 = vector.multi_reduction <add>, %252, %cst_80 [1] : vector<8x32xf32> to vector<8xf32>
    %258 = vector.shape_cast %257 : vector<8xf32> to vector<8x1xf32>
    %cst_81 = arith.constant 3.200000e+01 : f32
    %259 = vector.broadcast %cst_81 : f32 to vector<8x1xf32>
    %260 = arith.divf %258, %259 : vector<8x1xf32>
    %261 = vector.broadcast %260 : vector<8x1xf32> to vector<8x32xf32>
    %262 = arith.subf %252, %261 : vector<8x32xf32>
    %263 = arith.mulf %262, %262 : vector<8x32xf32>
    %cst_82 = arith.constant dense<0.000000e+00> : vector<8xf32>
    %264 = vector.multi_reduction <add>, %263, %cst_82 [1] : vector<8x32xf32> to vector<8xf32>
    %265 = vector.shape_cast %264 : vector<8xf32> to vector<8x1xf32>
    %cst_83 = arith.constant 3.200000e+01 : f32
    %266 = vector.broadcast %cst_83 : f32 to vector<8x1xf32>
    %267 = arith.divf %265, %266 : vector<8x1xf32>
    %cst_84 = arith.constant 9.99999974E-6 : f32
    %268 = vector.broadcast %cst_84 : f32 to vector<8x1xf32>
    %269 = arith.addf %267, %268 : vector<8x1xf32>
    %270 = math.sqrt %269 : vector<8x1xf32>
    %271 = vector.broadcast %270 : vector<8x1xf32> to vector<8x32xf32>
    %272 = arith.divf %262, %271 : vector<8x32xf32>
    %273 = vector.broadcast %254 : vector<1x32xf32> to vector<8x32xf32>
    %274 = arith.mulf %272, %273 : vector<8x32xf32>
    %275 = vector.broadcast %256 : vector<1x32xf32> to vector<8x32xf32>
    %276 = arith.addf %274, %275 : vector<8x32xf32>
    %c0_85 = arith.constant 0 : index
    %c0_86 = arith.constant 0 : index
    %c0_87 = arith.constant 0 : index
    %277 = vector.load %arg18[%c0_85, %c0_86, %c0_87] : memref<1x32x128xf32, #tpu.memory_space<vmem>>, vector<1x32x128xf32>
    %278 = vector.shape_cast %277 : vector<1x32x128xf32> to vector<32x128xf32>
    %cst_88 = arith.constant dense<0.000000e+00> : vector<8x128xf32>
    %279 = tpu.matmul %276, %278, %cst_88 {dimension_numbers = #tpu.dot_dimension_numbers<[1], [0], [0], [1], [0, 0, 1, 1], [], []>} : vector<8x32xf32>, vector<32x128xf32>, vector<8x128xf32> -> vector<8x128xf32>
    %c0_89 = arith.constant 0 : index
    %c0_90 = arith.constant 0 : index
    %c0_91 = arith.constant 0 : index
    %280 = vector.load %arg19[%c0_89, %c0_90, %c0_91] : memref<1x1x128xf32, #tpu.memory_space<vmem>>, vector<1x1x128xf32>
    %281 = vector.shape_cast %280 : vector<1x1x128xf32> to vector<1x128xf32>
    %282 = vector.broadcast %281 : vector<1x128xf32> to vector<8x128xf32>
    %283 = arith.addf %279, %282 : vector<8x128xf32>
    %cst_92 = arith.constant 5.000000e-01 : f32
    %284 = vector.broadcast %cst_92 : f32 to vector<8x128xf32>
    %285 = arith.mulf %284, %283 : vector<8x128xf32>
    %cst_93 = arith.constant 4.471500e-02 : f32
    %286 = vector.broadcast %cst_93 : f32 to vector<8x128xf32>
    %287 = arith.mulf %286, %283 : vector<8x128xf32>
    %288 = arith.mulf %287, %283 : vector<8x128xf32>
    %289 = arith.mulf %288, %283 : vector<8x128xf32>
    %290 = arith.addf %283, %289 : vector<8x128xf32>
    %cst_94 = arith.constant 0.797884583 : f32
    %291 = vector.broadcast %cst_94 : f32 to vector<8x128xf32>
    %292 = arith.mulf %291, %290 : vector<8x128xf32>
    %293 = math.tanh %292 : vector<8x128xf32>
    %cst_95 = arith.constant 1.000000e+00 : f32
    %294 = vector.broadcast %cst_95 : f32 to vector<8x128xf32>
    %295 = arith.addf %294, %293 : vector<8x128xf32>
    %296 = arith.mulf %285, %295 : vector<8x128xf32>
    %c0_96 = arith.constant 0 : index
    %c0_97 = arith.constant 0 : index
    %c0_98 = arith.constant 0 : index
    %297 = vector.load %arg20[%c0_96, %c0_97, %c0_98] : memref<1x128x32xf32, #tpu.memory_space<vmem>>, vector<1x128x32xf32>
    %298 = vector.shape_cast %297 : vector<1x128x32xf32> to vector<128x32xf32>
    %cst_99 = arith.constant dense<0.000000e+00> : vector<8x32xf32>
    %299 = tpu.matmul %296, %298, %cst_99 {dimension_numbers = #tpu.dot_dimension_numbers<[1], [0], [0], [1], [0, 0, 1, 1], [], []>} : vector<8x128xf32>, vector<128x32xf32>, vector<8x32xf32> -> vector<8x32xf32>
    %300 = arith.addf %252, %299 : vector<8x32xf32>
    %c0_100 = arith.constant 0 : index
    %c0_101 = arith.constant 0 : index
    %c0_102 = arith.constant 0 : index
    %301 = vector.load %arg21[%c0_100, %c0_101, %c0_102] : memref<1x1x32xf32, #tpu.memory_space<vmem>>, vector<1x1x32xf32>
    %302 = vector.shape_cast %301 : vector<1x1x32xf32> to vector<1x32xf32>
    %303 = vector.broadcast %302 : vector<1x32xf32> to vector<8x32xf32>
    %304 = arith.addf %300, %303 : vector<8x32xf32>
    %c0_103 = arith.constant 0 : index
    %c0_104 = arith.constant 0 : index
    %305 = vector.load %arg27[%c0_103, %c0_104] : memref<8x32xf32, #tpu.memory_space<vmem>>, vector<8x32xf32>
    tpu.vector_store %arg27[%c0_103, %c0_104], %304 {strides = array<i32>} : memref<8x32xf32, #tpu.memory_space<vmem>>, vector<8x32xf32>,
    %c1_i32 = arith.constant 1 : i32
    %306 = arith.cmpi eq, %arg1, %c1_i32 : i32
    %307 = arith.extui %306 : i1 to i32
    %c0_i32_105 = arith.constant 0 : i32
    %308 = arith.cmpi ne, %307, %c0_i32_105 : i32
    scf.if %308 {
      %c0_106 = arith.constant 0 : index
      %c0_107 = arith.constant 0 : index
      %309 = vector.load %arg22[%c0_106, %c0_107] : memref<1x32xf32, #tpu.memory_space<vmem>>, vector<1x32xf32>
      %c0_108 = arith.constant 0 : index
      %c0_109 = arith.constant 0 : index
      %310 = vector.load %arg23[%c0_108, %c0_109] : memref<1x32xf32, #tpu.memory_space<vmem>>, vector<1x32xf32>
      %cst_110 = arith.constant dense<0.000000e+00> : vector<8xf32>
      %311 = vector.multi_reduction <add>, %304, %cst_110 [1] : vector<8x32xf32> to vector<8xf32>
      %312 = vector.shape_cast %311 : vector<8xf32> to vector<8x1xf32>
      %cst_111 = arith.constant 3.200000e+01 : f32
      %313 = vector.broadcast %cst_111 : f32 to vector<8x1xf32>
      %314 = arith.divf %312, %313 : vector<8x1xf32>
      %315 = vector.broadcast %314 : vector<8x1xf32> to vector<8x32xf32>
      %316 = arith.subf %304, %315 : vector<8x32xf32>
      %317 = arith.mulf %316, %316 : vector<8x32xf32>
      %cst_112 = arith.constant dense<0.000000e+00> : vector<8xf32>
      %318 = vector.multi_reduction <add>, %317, %cst_112 [1] : vector<8x32xf32> to vector<8xf32>
      %319 = vector.shape_cast %318 : vector<8xf32> to vector<8x1xf32>
      %cst_113 = arith.constant 3.200000e+01 : f32
      %320 = vector.broadcast %cst_113 : f32 to vector<8x1xf32>
      %321 = arith.divf %319, %320 : vector<8x1xf32>
      %cst_114 = arith.constant 9.99999974E-6 : f32
      %322 = vector.broadcast %cst_114 : f32 to vector<8x1xf32>
      %323 = arith.addf %321, %322 : vector<8x1xf32>
      %324 = math.sqrt %323 : vector<8x1xf32>
      %325 = vector.broadcast %324 : vector<8x1xf32> to vector<8x32xf32>
      %326 = arith.divf %316, %325 : vector<8x32xf32>
      %327 = vector.broadcast %309 : vector<1x32xf32> to vector<8x32xf32>
      %328 = arith.mulf %326, %327 : vector<8x32xf32>
      %329 = vector.broadcast %310 : vector<1x32xf32> to vector<8x32xf32>
      %330 = arith.addf %328, %329 : vector<8x32xf32>
      %c0_115 = arith.constant 0 : index
      %c0_116 = arith.constant 0 : index
      %331 = vector.load %arg24[%c0_115, %c0_116] : memref<32x128xf32, #tpu.memory_space<vmem>>, vector<32x128xf32>
      %cst_117 = arith.constant dense<0.000000e+00> : vector<8x128xf32>
      %332 = tpu.matmul %330, %331, %cst_117 {dimension_numbers = #tpu.dot_dimension_numbers<[1], [0], [0], [1], [0, 0, 1, 1], [], []>} : vector<8x32xf32>, vector<32x128xf32>, vector<8x128xf32> -> vector<8x128xf32>
      %c0_118 = arith.constant 0 : index
      %c0_119 = arith.constant 0 : index
      %333 = vector.load %arg25[%c0_118, %c0_119] : memref<1x128xf32, #tpu.memory_space<vmem>>, vector<1x128xf32>
      %334 = vector.broadcast %333 : vector<1x128xf32> to vector<8x128xf32>
      %335 = arith.addf %332, %334 : vector<8x128xf32>
      %c0_120 = arith.constant 0 : index
      %c0_121 = arith.constant 0 : index
      %336 = vector.load %arg26[%c0_120, %c0_121] : memref<8x128xf32, #tpu.memory_space<vmem>>, vector<8x128xf32>
      tpu.vector_store %arg26[%c0_120, %c0_121], %335 {strides = array<i32>} : memref<8x128xf32, #tpu.memory_space<vmem>>, vector<8x128xf32>,
    } else {
    }
    return
  }
  func.func @transform_0(%arg0: i32, %arg1: i32) -> (i32, i32) {
    %c0_i32 = arith.constant 0 : i32
    %c0_i32_0 = arith.constant 0 : i32
    return %arg0, %c0_i32 : i32, i32
  }
  func.func @transform_1(%arg0: i32, %arg1: i32) -> (i32, i32) {
    %c0_i32 = arith.constant 0 : i32
    %c0_i32_0 = arith.constant 0 : i32
    %c0_i32_1 = arith.constant 0 : i32
    return %c0_i32, %c0_i32_0 : i32, i32
  }
  func.func @transform_2(%arg0: i32, %arg1: i32) -> (i32, i32) {
    %c0_i32 = arith.constant 0 : i32
    %c0_i32_0 = arith.constant 0 : i32
    %c0_i32_1 = arith.constant 0 : i32
    return %c0_i32, %c0_i32_0 : i32, i32
  }
  func.func @transform_3(%arg0: i32, %arg1: i32) -> (i32, i32) {
    %c0_i32 = arith.constant 0 : i32
    %c0_i32_0 = arith.constant 0 : i32
    %c0_i32_1 = arith.constant 0 : i32
    return %c0_i32, %c0_i32_0 : i32, i32
  }
  func.func @transform_4(%arg0: i32, %arg1: i32) -> (i32, i32) {
    %c0_i32 = arith.constant 0 : i32
    %c0_i32_0 = arith.constant 0 : i32
    %c0_i32_1 = arith.constant 0 : i32
    return %c0_i32, %c0_i32_0 : i32, i32
  }
  func.func @transform_5(%arg0: i32, %arg1: i32) -> (i32, i32) {
    %c0_i32 = arith.constant 0 : i32
    %c0_i32_0 = arith.constant 0 : i32
    %c0_i32_1 = arith.constant 0 : i32
    return %c0_i32, %c0_i32_0 : i32, i32
  }
  func.func @transform_6(%arg0: i32, %arg1: i32) -> (i32, i32) {
    %c0_i32 = arith.constant 0 : i32
    %c0_i32_0 = arith.constant 0 : i32
    %c0_i32_1 = arith.constant 0 : i32
    return %c0_i32, %c0_i32_0 : i32, i32
  }
  func.func @transform_7(%arg0: i32, %arg1: i32) -> (i32, i32) {
    %c0_i32 = arith.constant 0 : i32
    %c0_i32_0 = arith.constant 0 : i32
    %c0_i32_1 = arith.constant 0 : i32
    return %c0_i32, %c0_i32_0 : i32, i32
  }
  func.func @transform_8(%arg0: i32, %arg1: i32) -> (i32, i32) {
    %c0_i32 = arith.constant 0 : i32
    %c0_i32_0 = arith.constant 0 : i32
    %c0_i32_1 = arith.constant 0 : i32
    return %c0_i32, %c0_i32_0 : i32, i32
  }
  func.func @transform_9(%arg0: i32, %arg1: i32) -> (i32, i32, i32) {
    %c0_i32 = arith.constant 0 : i32
    %c0_i32_0 = arith.constant 0 : i32
    %c0_i32_1 = arith.constant 0 : i32
    return %arg1, %c0_i32, %c0_i32_0 : i32, i32, i32
  }
  func.func @transform_10(%arg0: i32, %arg1: i32) -> (i32, i32, i32) {
    %c0_i32 = arith.constant 0 : i32
    %c0_i32_0 = arith.constant 0 : i32
    %c0_i32_1 = arith.constant 0 : i32
    return %arg1, %c0_i32, %c0_i32_0 : i32, i32, i32
  }
  func.func @transform_11(%arg0: i32, %arg1: i32) -> (i32, i32, i32) {
    %c0_i32 = arith.constant 0 : i32
    %c0_i32_0 = arith.constant 0 : i32
    %c0_i32_1 = arith.constant 0 : i32
    return %arg1, %c0_i32, %c0_i32_0 : i32, i32, i32
  }
  func.func @transform_12(%arg0: i32, %arg1: i32) -> (i32, i32, i32) {
    %c0_i32 = arith.constant 0 : i32
    %c0_i32_0 = arith.constant 0 : i32
    %c0_i32_1 = arith.constant 0 : i32
    return %arg1, %c0_i32, %c0_i32_0 : i32, i32, i32
  }
  func.func @transform_13(%arg0: i32, %arg1: i32) -> (i32, i32, i32) {
    %c0_i32 = arith.constant 0 : i32
    %c0_i32_0 = arith.constant 0 : i32
    %c0_i32_1 = arith.constant 0 : i32
    return %arg1, %c0_i32, %c0_i32_0 : i32, i32, i32
  }
  func.func @transform_14(%arg0: i32, %arg1: i32) -> (i32, i32, i32) {
    %c0_i32 = arith.constant 0 : i32
    %c0_i32_0 = arith.constant 0 : i32
    %c0_i32_1 = arith.constant 0 : i32
    return %arg1, %c0_i32, %c0_i32_0 : i32, i32, i32
  }
  func.func @transform_15(%arg0: i32, %arg1: i32) -> (i32, i32, i32) {
    %c0_i32 = arith.constant 0 : i32
    %c0_i32_0 = arith.constant 0 : i32
    %c0_i32_1 = arith.constant 0 : i32
    return %arg1, %c0_i32, %c0_i32_0 : i32, i32, i32
  }
  func.func @transform_16(%arg0: i32, %arg1: i32) -> (i32, i32, i32) {
    %c0_i32 = arith.constant 0 : i32
    %c0_i32_0 = arith.constant 0 : i32
    %c0_i32_1 = arith.constant 0 : i32
    return %arg1, %c0_i32, %c0_i32_0 : i32, i32, i32
  }
  func.func @transform_17(%arg0: i32, %arg1: i32) -> (i32, i32, i32) {
    %c0_i32 = arith.constant 0 : i32
    %c0_i32_0 = arith.constant 0 : i32
    %c0_i32_1 = arith.constant 0 : i32
    return %arg1, %c0_i32, %c0_i32_0 : i32, i32, i32
  }
  func.func @transform_18(%arg0: i32, %arg1: i32) -> (i32, i32, i32) {
    %c0_i32 = arith.constant 0 : i32
    %c0_i32_0 = arith.constant 0 : i32
    %c0_i32_1 = arith.constant 0 : i32
    return %arg1, %c0_i32, %c0_i32_0 : i32, i32, i32
  }
  func.func @transform_19(%arg0: i32, %arg1: i32) -> (i32, i32, i32) {
    %c0_i32 = arith.constant 0 : i32
    %c0_i32_0 = arith.constant 0 : i32
    %c0_i32_1 = arith.constant 0 : i32
    return %arg1, %c0_i32, %c0_i32_0 : i32, i32, i32
  }
  func.func @transform_20(%arg0: i32, %arg1: i32) -> (i32, i32) {
    %c0_i32 = arith.constant 0 : i32
    %c0_i32_0 = arith.constant 0 : i32
    %c0_i32_1 = arith.constant 0 : i32
    return %c0_i32, %c0_i32_0 : i32, i32
  }
  func.func @transform_21(%arg0: i32, %arg1: i32) -> (i32, i32) {
    %c0_i32 = arith.constant 0 : i32
    %c0_i32_0 = arith.constant 0 : i32
    %c0_i32_1 = arith.constant 0 : i32
    return %c0_i32, %c0_i32_0 : i32, i32
  }
  func.func @transform_22(%arg0: i32, %arg1: i32) -> (i32, i32) {
    %c0_i32 = arith.constant 0 : i32
    %c0_i32_0 = arith.constant 0 : i32
    %c0_i32_1 = arith.constant 0 : i32
    return %c0_i32, %c0_i32_0 : i32, i32
  }
  func.func @transform_23(%arg0: i32, %arg1: i32) -> (i32, i32) {
    %c0_i32 = arith.constant 0 : i32
    %c0_i32_0 = arith.constant 0 : i32
    %c0_i32_1 = arith.constant 0 : i32
    return %c0_i32, %c0_i32_0 : i32, i32
  }
  func.func @transform_24(%arg0: i32, %arg1: i32) -> (i32, i32) {
    %c0_i32 = arith.constant 0 : i32
    %c0_i32_0 = arith.constant 0 : i32
    return %arg0, %c0_i32 : i32, i32
  }
}

</mosaic_0001>

<bundles_post_ra>
// kernel: transformer_forward.1
= control target key start
LH: loop header
LB: loop body
LE: loop exit
PB: predicated region body
PF: predicated region fallthrough
CT: control target
= control target key end

     0   :  { %s5040_s0 = inlined_call_operand.vmem [shape: s32[16,1], index: 0, kind: input, shape index: {}]   ;;  %s5041_s1 = inlined_call_operand.vmem [shape: f32[2,10], index: 1, kind: input, shape index: {}]   ;;  %s5042_s2 = inlined_call_operand.vmem [shape: s32[2,1], index: 2, kind: input, shape index: {}]   ;;  %s5043_s3 = inlined_call_operand.vmem [shape: f32[128,32], index: 3, kind: input, shape index: {}]   ;;  %s5044_s4 = inlined_call_operand.vmem [shape: f32[8,32], index: 4, kind: input, shape index: {}]   ;;  %s5045_s5 = inlined_call_operand.vmem [shape: f32[10,32], index: 5, kind: input, shape index: {}]   ;;  %s5046_s6 = inlined_call_operand.vmem [shape: f32[1,32], index: 6, kind: input, shape index: {}]   ;;  %s5047_s7 = inlined_call_operand.vmem [shape: f32[64,32], index: 7, kind: input, shape index: {}]   ;;  %s5048_s8 = inlined_call_operand.vmem [shape: f32[8,8], index: 8, kind: input, shape index: {}]   ;;  %s5049_s9 = inlined_call_operand.vmem [shape: f32[2,1,32], index: 9, kind: input, shape index: {}]   ;;  %s5050_s10 = inlined_call_operand.vmem [shape: f32[2,1,32], index: 10, kind: input, shape index: {}]   ;;  %s5051_s11 = inlined_call_operand.vmem [shape: f32[2,32,96], index: 11, kind: input, shape index: {}]   ;;  %s5052_s12 = inlined_call_operand.vmem [shape: f32[2,32,32], index: 12, kind: input, shape index: {}]   ;;  %s5053_s13 = inlined_call_operand.vmem [shape: f32[2,1,32], index: 13, kind: input, shape index: {}]   ;;  %s5054_s14 = inlined_call_operand.vmem [shape: f32[2,1,32], index: 14, kind: input, shape index: {}]   ;;  %s5055_s15 = inlined_call_operand.vmem [shape: f32[2,1,32], index: 15, kind: input, shape index: {}]   ;;  %s5056_s16 = inlined_call_operand.vmem [shape: f32[2,32,128], index: 16, kind: input, shape index: {}]   ;;  %s5057_s17 = inlined_call_operand.vmem [shape: f32[2,1,128], index: 17, kind: input, shape index: {}]   ;;  %s5058_s18 = inlined_call_operand.vmem [shape: f32[2,128,32], index: 18, kind: input, shape index: {}]   ;;  %s5059_s19 = inlined_call_operand.vmem [shape: f32[2,1,32], index: 19, kind: input, shape index: {}]   ;;  %s5060_s20 = inlined_call_operand.vmem [shape: f32[1,32], index: 20, kind: input, shape index: {}]   ;;  %s5061_s21 = inlined_call_operand.vmem [shape: f32[1,32], index: 21, kind: input, shape index: {}]   ;;  %s5062_s22 = inlined_call_operand.vmem [shape: f32[32,128], index: 22, kind: input, shape index: {}]   ;;  %s5063_s23 = inlined_call_operand.vmem [shape: f32[1,128], index: 23, kind: input, shape index: {}]   ;;  %s5064_s24 = inlined_call_operand.hbm [shape: f32[16,128], index: 24, kind: output, shape index: {}]  }
   0x1   :  { %5086 = sst [smem:[#allocation19_spill]] %s5040_s0 }
   0x2   :  { %5087 = sst [smem:[#allocation20_spill]] %s5041_s1 }
   0x3   :  { %5088 = sst [smem:[#allocation21_spill]] %s5042_s2 }
   0x4   :  { %5089 = sst [smem:[#allocation22_spill]] %s5043_s3 }
   0x5   :  { %5090 = sst [smem:[#allocation23_spill]] %s5044_s4 }
   0x6   :  { %5091 = sst [smem:[#allocation24_spill]] %s5045_s5 }
   0x7   :  { %5092 = sst [smem:[#allocation25_spill]] %s5046_s6 }
   0x8   :  { %5093 = sst [smem:[#allocation26_spill]] %s5047_s7 }
   0x9   :  { %5094 = sst [smem:[#allocation27_spill]] %s5048_s8 }
   0xa   :  { %5095 = sst [smem:[#allocation28_spill]] %s5051_s11 }
   0xb   :  { %5096 = sst [smem:[#allocation29_spill]] %s5052_s12 }
   0xc   :  { %5097 = sst [smem:[#allocation30_spill]] %s5060_s20 }
   0xd   :  { %5098 = sst [smem:[#allocation31_spill]] %s5061_s21 }
   0xe   :  { %5099 = sst [smem:[#allocation32_spill]] %s5062_s22 }
   0xf   :  { %5100 = sst [smem:[#allocation33_spill]] %s5063_s23 }
  0x10   :  { %5101 = sst [smem:[#allocation34_spill]] %s5064_s24 }
  0x11   :  { %29 = vsyncpa [#allocation4], 0 }
  0x12   :  { %31 = vsyncpa [#allocation4 + $0x1], 0  ;;  %s4379_s5 = smov 0   ;;  %s4381_s26 = smov 0  }
  0x13   :  { %s4383_s27 = smov 0   ;;  %s4385_s28 = smov 0  }
  0x14   :  { %s4387_s6 = smov 0   ;;  %s4389_s2 = smov 0  }
  0x15   :  { %s4391_s29 = smov 0   ;;  %s4393_s0 = smov 0  }
  0x16 LB: > { %5102 = sst [smem:[#allocation6_spill]] %s4208_s5  ;;  %s3481_s7 = sadd.s32 4294967295, %s4236_s0   ;;  %s4236_s0 = sphi %s4393_s0, %s37_s0   ;;  %s4232_s29 = sphi %s4391_s29, %s5159_s29   ;;  %s4228_s2 = sphi %s4389_s2, %s5158_s2   ;;  %s4224_s6 = sphi %s4387_s6, %s5157_s6   ;;  %s4220_s28 = sphi %s4385_s28, %s5156_s28   ;;  %s4216_s27 = sphi %s4383_s27, %s5155_s27   ;;  %s4212_s26 = sphi %s4381_s26, %s5154_s26   ;;  %s4208_s5 = sphi %s4379_s5, %s5153_s5  }
  0x17   : > { %5103 = sst [smem:[#allocation7_spill]] %s4212_s26  ;;  %s3482_s30 = sadd.s32 4294967294, %s4236_s0  }
  0x18   : > { %5104 = sst [smem:[#allocation8_spill]] %s4216_s27  ;;  %s46_s3 = sadd.s32 1, %s4228_s2 }
  0x19   : > { %5105 = sst [smem:[#allocation9_spill]] %s4224_s6  ;;  %p47_p0 = scmp.ge.s32.totalorder %s46_s3, 2 }
  0x1a   : > { %5106 = sst [smem:[#allocation10_spill]] %s4228_s2  ;;  %s49_s25 = sadd.s32 1, %s4232_s29 }
  0x1b   : > { %5107 = sst [smem:[#allocation11_spill]] %s4232_s29  ;;  %p630_p1 = scmp.ne.s32.totalorder %s4216_s27, %s4212_s26 }
  0x1c   : > { %5108 = sst [smem:[#allocation12_spill]] %s4236_s0  ;;  %p631_p2 = scmp.eq.s32.totalorder %s3481_s7, 3 }
  0x1d   : > { %s5161_s3 = smov (%p47_p0, %s46_s3), 0  ;;  %s5163_s25 = smov (!%p47_p0, %s49_s25), %s4232_s29 }
  0x1e   : > { %5109 = sst [smem:[#allocation13_spill]] %s5161_s3  ;;  %p4428_p3 = por %p631_p2, %p630_p1 }
  0x1f   : > { %p636_p4 = scmp.ne.s32.totalorder %s4212_s26, %s4208_s5  ;;  %p51_p5 = scmp.ge.s32.totalorder %s5163_s25, 2 }
  0x20   : > { %s5110_s8 = scalar_select %p4428_p3, 1, 0 }
  0x21   : > { %p637_p6 = scmp.eq.s32.totalorder %s3482_s30, 3  ;;  %p3485_p7 = scmp.ge.s32.totalorder %s4236_s0, 1 }
  0x22   : > { %5111 = sst [smem:[#allocation14_spill]] %s5110_s8  ;;  %p772_p8 = scmp.lt.s32.totalorder %s4236_s0, 5 }
  0x23   : > { %s5165_s25 = smov (%p51_p5, %s5163_s25), 0  ;;  %p4438_p9 = por %p637_p6, %p636_p4 }
  0x24   : > { %5112 = sst [smem:[#allocation15_spill]] %s5165_s25  ;;  %p773_p10 = pnand %p3485_p7, %p772_p8 }
  0x25   : > { %s5113_s4 = scalar_select %p4438_p9, 1, 0 }
  0x26   : > { %s617_s1 = ssub.s32 %s4232_s29, %s5165_s25  ;;  %s620_s7 = sadd.s32 1, %s4216_s27 }
  0x27   : > { %5114 = sst [smem:[#allocation16_spill]] %s5113_s4  ;;  %p618_p11 = scmp.eq.s32.totalorder %s617_s1, 0 }
  0x28   : > { %776 = sbr.rel (%p773_p10) target bundleno = 3689 (0xe69), region = 116 }
  0x29   : > { %s4446_s3 = scalar_select %p618_p11, %s4216_s27, %s620_s7  }
  0x2b   : > { %5115 = sst [smem:[#allocation17_spill]] %s4446_s3 }
  0x2f   : > { %s5073_s30 = sand.u32 1, %s4212_s26   ;;  %p878_p12 = scmp.lt.s32.totalorder %s4224_s6, 1 }
  0x30   : > { %s4452_s2 = sshll.u32 %s5073_s30, 3  ;;  %p882_p13 = scmp.lt.s32.totalorder %s4220_s28, 1 }
  0x31   : > { %s879_s4 = scalar_select %p878_p12, %s4224_s6, 1 }
  0x32   : > { %s4457_s5 = scalar_select %p882_p13, %s4220_s28, 1 }
  0x33   : > { %s3487_s1 = sshll.u32 %s879_s4, 3  ;;  %s5116_s29 = sld [smem:[#allocation19_spill]] }
  0x34   : > { %s3558_s23 = sshll.u32 %s4457_s5, 5  ;;  %s5117_s11 = sld [smem:[#allocation28_spill]] }
  0x35   : > { %s5118_s12 = sld [smem:[#allocation29_spill]]  ;;  %s903_s24 = scalar_lea.vmem %s5054_s14, %s4457_s5 }
  0x36   : > { %s906_s0 = scalar_lea.vmem %s5055_s15, %s4457_s5  ;;  %s922_s26 = scalar_lea.vmem %s5059_s19, %s4457_s5 }
  0x37   : > { %p3496_p0 = scmp.ne.s32.totalorder %s4220_s28, 0 }
  0x38   : > { %s5120_s21 = sld [smem:[#allocation21_spill]] (!%p3496_p0)  ;;  %v4238_v2 = vmov (!%p3496_p0), 0   ;;  %v4239_v3 = vmov (!%p3496_p0), 0.0|0.0   ;;  %vm1045_vm0 = vcmask (!%p3496_p0), 1041408   ;;  %s5122_s6 = sld [smem:[#allocation24_spill]] (!%p3496_p0)  ;;  %vm4240_vm1 = vmmov (!%p3496_p0), 1  }
  0x39   : > { %s4462_s30 = scalar_lea.vmem %s5116_s29, %s3487_s1  ;;  %926 = sbr.rel (%p3496_p0) target bundleno = 627 (0x273), region = 120  ;;  %4075 = vset.pattern.permute.xlu0 (!%p3496_p0), %v4238_v2  ;;  %3887 = vmatprep.subr.bf16.mxu0 (!%p3496_p0), %v4239_v3  ;;  %vm3913_vm2 = vmpackc.low (!%p3496_p0), %vm1045_vm0, %vm4240_vm1  ;;  %vm4241_vm3 = vmmov (!%p3496_p0), 0   ;;  %v4242_v11 = vmov (!%p3496_p0), 0.0   ;;  %vm1041_vm4 = vcmask (!%p3496_p0), 80896   ;;  %v927_v45 = vlaneseq (!%p3496_p0) }
  0x3a   : > { %s4476_s22 = scalar_lea.vmem %s5117_s11, %s3558_s23  ;;  %s4498_s11 = scalar_lea.vmem %s5056_s16, %s3558_s23  ;;  %3911 = vmatprep.subr.bf16.mxu1 (!%p3496_p0), %v4239_v3  ;;  %v929_v9 = vld [vmem:[%s4462_s30] sm:$0xff] (!%p3496_p0)  ;;  %3701 = vmatprep.mubr.msk.f32.mxu1 (!%p3496_p0), %vm4241_vm3, %v4242_v11  ;;  %vm1119_vm5 = vcmask (!%p3496_p0), 523264   ;;  %v4243_v50 = vmov (!%p3496_p0), 1.0   ;;  %vm1205_vm9 = vcmask (!%p3496_p0), 15360   ;;  %vm1287_vm10 = vcmask (!%p3496_p0), 261120  }
  0x3b   : > { %s4481_s25 = scalar_lea.vmem %s5118_s12, %s3558_s23  ;;  %s5121_s12 = sld [smem:[#allocation22_spill]] (!%p3496_p0)  ;;  %3694 = vmatprep.mubr.msk.f32.mxu0 (!%p3496_p0), %vm4241_vm3, %v4242_v11  ;;  %v928_v46 = vand.u32 (!%p3496_p0), 127, %v927_v45  ;;  %v1283_v62 = vshrl.u32 (!%p3496_p0), %v927_v45, 7 }
  0x3c   : > { %5119 = sst [smem:[#allocation18_spill]] %s4481_s25  ;;  %s3561_s25 = sshll.u32 %s4457_s5, 7 }
  0x3d   : > { %s4508_s27 = scalar_lea.vmem %s5058_s18, %s3561_s25  ;;  %s5124_s3 = sld [smem:[#allocation26_spill]] (!%p3496_p0)  ;;  %v1284_v63 = vsub.s32 (!%p3496_p0), 0, %v1283_v62 }
  0x3e   : > { %v1023_v0 = vld [vmem:[%s5120_s21] sm:$0x3] (!%p3496_p0)  ;;  %s5123_s4 = smov (!%p3496_p0), %s5122_s6  ;;  %s5125_s1 = sld [smem:[#allocation20_spill]] (!%p3496_p0) }
  0x3f   : > { %1025 = vperm.xlu0 (!%p3496_p0), %4075, %v1023_v0   ;;  %v1039_v8 = vld [vmem:[%s5122_s6] sm:$0xff] (!%p3496_p0)  ;;  %v1040_v10 = vld [vmem:[%s5123_s4 + $0x8] sm:$0x3] (!%p3496_p0)  ;;  %s5126_s23 = sld [smem:[#allocation9_spill]] (!%p3496_p0)  ;;  %s5127_s6 = sld [smem:[#allocation25_spill]] (!%p3496_p0) }
  0x40   : > { %v3912_v13 = vpack.c.bf16 %v1040_v10, %v1039_v8  ;;  %s5128_s29 = sld [smem:[#allocation23_spill]] }
  0x41   : > { %v936_v1 = vld [vmem:[%s5121_s12] sm:$0xff]  ;;  %v937_v4 = vld [vmem:[%s5121_s12 + $0x8] sm:$0xff]  ;;  %v938_v5 = vld [vmem:[%s5121_s12 + $0x10] sm:$0xff] }
  0x42   : > { %v939_v6 = vld [vmem:[%s5121_s12 + $0x18] sm:$0xff]  ;;  %v3888_v7 = vpack.c.bf16 %v937_v4, %v936_v1  ;;  %v940_v15 = vld [vmem:[%s5121_s12 + $0x20] sm:$0xff]  ;;  %v941_v16 = vld [vmem:[%s5121_s12 + $0x28] sm:$0xff]  ;;  %3914 = vmatpush3.bf16.msk.msra.mxu1 %vm3913_vm2, %v3912_v13 }
  0x43   : > { %v3891_v12 = vpack.c.bf16 %v939_v6, %v938_v5  ;;  %v1030_v14 = vld [vmem:[%s5124_s3] sm:$0xff]  ;;  %v1031_v17 = vld [vmem:[%s5124_s3 + $0x8] sm:$0xff]  ;;  %931 = vperm.xlu0 %4075, %v929_v9   ;;  %3915 = vmatprep.subr.bf16.mxu1 %v4239_v3  ;;  %v1032_v20 = vld [vmem:[%s5124_s3 + $0x10] sm:$0xff]  ;;  %v3894_v22 = vpack.c.bf16 %v941_v16, %v940_v15 }
  0x44   : > { %3889 = vmatpush3.bf16.msra.mxu0 %v3888_v7  ;;  %v1038_v18 = vld [vmem:[%s5125_s1] sm:$0x3]  ;;  %v3916_v19 = vpack.c.bf16 %v1031_v17, %v1030_v14  ;;  %v1033_v21 = vld [vmem:[%s5124_s3 + $0x18] sm:$0xff]  ;;  %v942_v23 = vld [vmem:[%s5121_s12 + $0x30] sm:$0xff] }
  0x45   : > { %3890 = vmatprep.subr.bf16.mxu0 %v4239_v3  ;;  %v943_v24 = vld [vmem:[%s5121_s12 + $0x38] sm:$0xff]  ;;  %3702 = vmatmul.mubr.msk.f32.vlgmr.msra.gmra.mrb[0].mxu1 %vm1041_vm4, %v1038_v18  ;;  %v3919_v25 = vpack.c.bf16 %v1033_v21, %v1032_v20  ;;  %v1034_v26 = vld [vmem:[%s5124_s3 + $0x20] sm:$0xff]  ;;  %v1035_v27 = vld [vmem:[%s5124_s3 + $0x28] sm:$0xff]  ;;  %v1201_v53 = vstv %s5126_s23 }
  0x46   : > { %3917 = vmatpush3.bf16.msra.mxu1 %v3916_v19  ;;  %3720 = vmatprep.mubr.msk.f32.mxu1 %vm4241_vm3, %v4242_v11  ;;  %v3897_v28 = vpack.c.bf16 %v943_v24, %v942_v23  ;;  %v944_v29 = vld [vmem:[%s5121_s12 + $0x40] sm:$0xff]  ;;  %v945_v30 = vld [vmem:[%s5121_s12 + $0x48] sm:$0xff]  ;;  %v3922_v31 = vpack.c.bf16 %v1035_v27, %v1034_v26  ;;  %v1036_v32 = vld [vmem:[%s5124_s3 + $0x30] sm:$0xff]  ;;  %vm1202_vm8 = vcmp.eq.s32.totalorder %v928_v46, %v1201_v53 }
  0x47   : > { %3918 = vmatprep.subr.bf16.mxu1 %v4239_v3  ;;  %v1037_v33 = vld [vmem:[%s5124_s3 + $0x38] sm:$0xff]  ;;  %v3900_v34 = vpack.c.bf16 %v945_v30, %v944_v29  ;;  %v946_v35 = vld [vmem:[%s5121_s12 + $0x50] sm:$0xff]  ;;  %v948_v39 = vld [vmem:[%s5121_s12 + $0x60] sm:$0xff]  ;;  %v3504_v60 = vsel %vm1202_vm8, 1.0, %v4242_v11 }
  0x48   : > { %3892 = vmatpush3.bf16.msra.mxu0 %v3891_v12  ;;  %v947_v36 = vld [vmem:[%s5121_s12 + $0x58] sm:$0xff]  ;;  %v3925_v37 = vpack.c.bf16 %v1037_v33, %v1036_v32  ;;  %v949_v40 = vld [vmem:[%s5121_s12 + $0x68] sm:$0xff]  ;;  %v950_v42 = vld [vmem:[%s5121_s12 + $0x70] sm:$0xff] }
  0x49   : > { %3893 = vmatprep.subr.bf16.mxu0 %v4239_v3  ;;  %v3903_v38 = vpack.c.bf16 %v947_v36, %v946_v35  ;;  %v3906_v41 = vpack.c.bf16 %v949_v40, %v948_v39  ;;  %v951_v43 = vld [vmem:[%s5121_s12 + $0x78] sm:$0xff]  ;;  %v3503_v55 = vld [vmem:[%s5127_s6] ss:$0 sm:$0xff] }
  0x4a   : > { %3920 = vmatpush3.bf16.msra.mxu1 %v3919_v25  ;;  %v3909_v44 = vpack.c.bf16 %v951_v43, %v950_v42  ;;  %v952_v0 = vld [vmem:[%s5128_s29] sm:$0xff] }
  0x4b   : > { %3921 = vmatprep.subr.bf16.mxu1 %v4239_v3 }
  0x4c   : > { %3895 = vmatpush3.bf16.msra.mxu0 %v3894_v22 }
  0x4d   : > { %3896 = vmatprep.subr.bf16.mxu0 %v4239_v3 }
  0x4e   : > { %3923 = vmatpush3.bf16.msra.mxu1 %v3922_v31 }
  0x4f   : > { %3924 = vmatprep.subr.bf16.mxu1 %v4239_v3 }
  0x50   : > { %3898 = vmatpush3.bf16.msra.mxu0 %v3897_v28 }
  0x51   : > { %3899 = vmatprep.subr.bf16.mxu0 %v4239_v3 }
  0x52   : > { %3926 = vmatpush3.bf16.msra.mxu1 %v3925_v37 }
  0x53   : > { %3723 = vmatprep.subr.mxu1 %v4242_v11 }
  0x54   : > { %3901 = vmatpush3.bf16.msra.mxu0 %v3900_v34 }
  0x55   : > { %3902 = vmatprep.subr.bf16.mxu0 %v4239_v3 }
  0x58   : > { %3904 = vmatpush3.bf16.msra.mxu0 %v3903_v38 }
  0x59   : > { %3905 = vmatprep.subr.bf16.mxu0 %v4239_v3 }
  0x5c   : > { %3907 = vmatpush3.bf16.msra.mxu0 %v3906_v41 }
  0x5d   : > { %3908 = vmatprep.subr.bf16.mxu0 %v4239_v3 }
  0x60   : > { %3910 = vmatpush3.bf16.msra.mxu0 %v3909_v44 }
  0xbe   : > { %v1026_v47 = vpop.permute.xlu0 %1025 }
  0xbf   : > { %vm1027_vm6 = vcmp.eq.s32.totalorder %v928_v46, %v1026_v47 }
  0xc0   : > { %v3499_v48 = vsel %vm1027_vm6, 1.0, %v4242_v11 }
  0xc1   : > { %3721 = vmatmul.mubr.msk.f32.vlgmr.msra.gmra.mrb[2].mxu1 %vm1119_vm5, %v3499_v48 }
  0xc2   : > { %v932_v49 = vpop.permute.xlu0 %931  ;;  %3725 = vmatprep.mubr.msk.f32.mxu1 %vm4241_vm3, %v4242_v11 }
  0xc3   : > { %vm933_vm7 = vcmp.eq.s32.totalorder %v928_v46, %v932_v49 }
  0xc4   : > { %3695 = vmatmul.mubr.msk.f32.vlgmr.msra.gmra.mrb[0].mxu0 %vm933_vm7, %v4243_v50 }
 0x118   : > { %v1115_v51 = vpop.f32.mrb[0].mxu1 }
 0x119   : > { %v3703_v52 = vpop.f32.mrb[1].mxu1 }
 0x194   : > { %v1189_v54 = vpop.f32.mrb[2].mxu1 }
 0x195   : > { %v1190_v56 = vadd.f32 %v1189_v54, %v1115_v51  ;;  %v3722_v57 = vpop.f32.mrb[3].mxu1 }
 0x197   : > { %v1200_v58 = vadd.f32 %v3503_v55, %v1190_v56  ;;  %v1019_v59 = vpop.f32.mrb[0].mxu0 }
 0x198   : > { %v3696_v61 = vpop.f32.mrb[1].mxu0  ;;  %v1020_v2 = vadd.f32 %v1019_v59, %v952_v0 }
 0x199   : > { %3724 = vmatpush3.msk.msra.mxu1 %vm1045_vm0, %v1200_v58 }
 0x19a   : > { %3726 = vmatmul.mubr.msk.f32.vlgmr.msra.gmra.mrb[4].mxu1 %vm1205_vm9, %v3504_v60 }
 0x26d   : > { %v1278_v1 = vpop.f32.mrb[4].mxu1 }
 0x26e   : > { %v1285_v3 = vrot.slane %v1278_v1, %v1284_v63  ;;  %v3727_v4 = vpop.f32.mrb[5].mxu1 }
 0x270   : > { %v1286_v5 = vadd.f32 %v1285_v3, %v1020_v2 }
 0x272   : > { %1288 = vst.msk [vmem:[#allocation2] sm:$0xff] %vm1287_vm10, %v1286_v5 }
 0x273 PF: > { %vm1293_vm11 = vcmask 261120   ;;  %v1329_v13 = vld [vmem:[%s4476_s22] sm:$0xff]  ;;  %v1330_v14 = vld [vmem:[%s4476_s22 + $0x8] sm:$0xff]  ;;  %v1331_v15 = vld [vmem:[%s4476_s22 + $0x10] sm:$0xff]  ;;  %v4244_v16 = vmov 0.0|0.0   ;;  %vm5084_vm12 = vmmov 0   ;;  %v1406_v21 = vlaneseq  ;;  %s5131_s7 = scalar_lea.vmem %s5049_s9, %s4457_s5  ;;  %s5132_s21 = scalar_lea.vmem %s5050_s10, %s4457_s5 }
 0x274   : > { %3927 = vmatprep.subr.bf16.mxu0 %v4244_v16  ;;  %v3928_v17 = vpack.c.bf16 %v1330_v14, %v1329_v13  ;;  %v1332_v18 = vld [vmem:[%s4476_s22 + $0x18] sm:$0xff]  ;;  %v4246_v19 = vmov 0.0   ;;  %s4247_s22 = smov 32   ;;  %v3507_v45 = vld [vmem:[%s5131_s7] ss:$0 sm:$0xff]  ;;  %s4248_s6 = smov 96  }
 0x275   : > { %3736 = vmatprep.mubr.msk.f32.mxu0 %vm5084_vm12, %v4246_v19  ;;  %3744 = vmatprep.subr.mxu1 %v4246_v19  ;;  %v3931_v20 = vpack.c.bf16 %v1332_v18, %v1331_v15  ;;  %v1407_v22 = vand.u32 127, %v1406_v21  ;;  %v3508_v47 = vld [vmem:[%s5132_s21] ss:$0 sm:$0xff]  ;;  %s4249_s8 = smov 64   ;;  %s5135_s1 = sld [smem:[#allocation18_spill]] }
 0x276   : > { %3746 = vmatprep.mubr.msk.f32.mxu1 %vm5084_vm12, %v4246_v19  ;;  %3929 = vmatpush3.bf16.msra.mxu0 %v3928_v17  ;;  %s5136_s23 = scalar_lea.vmem %s5053_s13, %s4457_s5  ;;  %p3549_p1 = scmp.ne.s32.totalorder %s4220_s28, 1 }
 0x277   : > { %3930 = vmatprep.subr.bf16.mxu0 %v4244_v16  ;;  %vm1409_vm13 = vcmp.lt.s32.totalorder %v1407_v22, 4  ;;  %vm1514_vm14 = vcmp.ge.s32.totalorder %v1407_v22, 4  ;;  %vm1515_vm15 = vcmp.lt.s32.totalorder %v1407_v22, 8  ;;  %vm1950_vm0 = vcmp.ge.s32.totalorder %v1407_v22, 12  ;;  %s5138_s29 = sld [smem:[#allocation32_spill]] (!%p3549_p1) }
 0x278   : > { %vm1516_vm1 = vmand %vm1514_vm14, %vm1515_vm15  ;;  %v4657_v23 = vsel %vm1409_vm13, 1.0, %v4246_v19  ;;  %vm1951_vm2 = vcmp.lt.s32.totalorder %v1407_v22, 16  ;;  %vm2130_vm3 = vcmp.ge.s32.totalorder %v1407_v22, 16  ;;  %vm2131_vm4 = vcmp.lt.s32.totalorder %v1407_v22, 20 }
 0x279   : > { %v4634_v6 = vld [vmem:[#allocation2] sm:$0xff]  ;;  %v4660_v24 = vsel %vm1516_vm1, 1.0, %v4246_v19  ;;  %vm4662_vm5 = vmand %vm1950_vm0, %vm1951_vm2  ;;  %vm2310_vm6 = vcmp.ge.s32.totalorder %v1407_v22, 20  ;;  %vm2311_vm7 = vcmp.lt.s32.totalorder %v1407_v22, 24  ;;  %vm2490_vm8 = vcmp.ge.s32.totalorder %v1407_v22, 24 }
 0x27a   : > { %v1294_v7 = vsel %vm1293_vm11, %v4634_v6, 0.0  ;;  %3932 = vmatpush3.bf16.msra.mxu0 %v3931_v20  ;;  %1520 = vrot.lane.b32.xlu1 %v4660_v24, %s4247_s22  ;;  %v4076_v26 = vpack.i.bf16 %v4657_v23, %v4660_v24  ;;  %vm2132_vm9 = vmand %vm2130_vm3, %vm2131_vm4  ;;  %vm2491_vm10 = vcmp.lt.s32.totalorder %v1407_v22, 28  ;;  %vm2670_vm13 = vcmp.ge.s32.totalorder %v1407_v22, 28 }
 0x27b   : > { %1295 = vadd.xlane.f32.xlu0 %v1294_v7  ;;  %3739 = vmatprep.subr.mxu0 %v4246_v19  ;;  %vm2312_vm14 = vmand %vm2310_vm6, %vm2311_vm7  ;;  %vm2671_vm15 = vcmp.lt.s32.totalorder %v1407_v22, 32  ;;  %vm1770_vm1 = vcmp.ge.s32.totalorder %v1407_v22, 8  ;;  %vm1771_vm12 = vcmp.lt.s32.totalorder %v1407_v22, 12  ;;  %v4670_v27 = vsel %vm2132_vm9, 1.0, %v4246_v19 }
 0x27c   : > { %v4673_v28 = vsel %vm2312_vm14, 1.0, %v4246_v19  ;;  %vm2492_vm0 = vmand %vm2490_vm8, %vm2491_vm10  ;;  %v3522_v32 = vsel %vm4662_vm5, 1.0, %v4246_v19  ;;  %vm5133_vm5 = vmmov 0   ;;  %vm1498_vm6 = vcmask 64512  }
 0x27d   : > { %v4086_v29 = vpack.i.bf16 %v4673_v28, %v4670_v27  ;;  %vm2672_vm2 = vmand %vm2670_vm13, %vm2671_vm15  ;;  %v4679_v30 = vsel %vm2492_vm0, 1.0, %v4246_v19  ;;  %vm4251_vm9 = vmmov (!%p3549_p1), 0  }
 0x27e   : > { %1414 = vrot.lane.b32.xlu1 %v4657_v23, %s4247_s22  ;;  %v4682_v31 = vsel %vm2672_vm2, 1.0, %v4246_v19  ;;  %vm1772_vm3 = vmand %vm1770_vm1, %vm1771_vm12 }
 0x27f   : > { %v4091_v33 = vpack.i.bf16 %v4682_v31, %v4679_v30  ;;  %v3518_v34 = vsel %vm1772_vm3, 1.0, %v4246_v19 }
 0x280   : > { %v4081_v35 = vpack.i.bf16 %v3522_v32, %v3518_v34 }
 0x282   : > { %1956 = vrot.lane.b32.xlu1 %v3522_v32, %s4247_s22 }
 0x286   : > { %2136 = vrot.lane.b32.xlu1 %v4670_v27, %s4247_s22 }
 0x28a   : > { %2316 = vrot.lane.b32.xlu1 %v4673_v28, %s4247_s22 }
 0x28e   : > { %2496 = vrot.lane.b32.xlu1 %v4679_v30, %s4247_s22 }
 0x292   : > { %2676 = vrot.lane.b32.xlu1 %v4682_v31, %s4247_s22 }
 0x2ec   : > { %v1521_v50 = vpop.permute.xlu1 %1520 }
 0x2f0   : > { %v1415_v51 = vpop.permute.xlu1 %1414 }
 0x2f4   : > { %v1957_v52 = vpop.permute.xlu1 %1956 }
 0x2f8   : > { %v2137_v53 = vpop.permute.xlu1 %2136 }
 0x2fc   : > { %v2317_v54 = vpop.permute.xlu1 %2316 }
 0x300   : > { %v2497_v60 = vpop.permute.xlu1 %2496 }
 0x304   : > { %v2677_v1 = vpop.permute.xlu1 %2676 }
 0x308   : > { %v1296_v8 = vpop.xlane.xlu0 %1295 }
 0x309   : > { %v1298_v9 = vmul.f32 0.03125, %v1296_v8 }
 0x30b   : > { %v4639_v10 = vsub.f32 %v4634_v6, %v1298_v9 }
 0x30d   : > { %v1300_v11 = vmul.f32 %v4639_v10, %v4639_v10 }
 0x30f   : > { %v1301_v12 = vsel %vm1293_vm11, %v1300_v11, 0.0 }
 0x310   : > { %1302 = vadd.xlane.f32.xlu0 %v1301_v12 }
 0x326   : > { %1776 = vrot.lane.b32.xlu0 %v3518_v34, %s4247_s22  ;;  %s5134_s22 = sld [smem:[#allocation27_spill]] }
 0x32c   : > { %v1290_v15 = vld [vmem:[%s5134_s22] sm:$0xff]  ;;  %s5139_s22 = smov (!%p3549_p1), %s5138_s29 }
 0x39d   : > { %v1303_v36 = vpop.xlane.xlu0 %1302 }
 0x39e   : > { %v1304_v37 = vmul.f32 0.03125, %v1303_v36 }
 0x3a0   : > { %v1305_v38 = vadd.f32 1e-05, %v1304_v37 }
 0x3a1   : > { %v1777_v59 = vpop.permute.xlu0 %1776 }
 0x3a2   : > { %4096 = vrsqrt.f32 %v1305_v38  ;;  %vm1308_vm12 = vcmp.eq.f32.partialorder %v1305_v38, inf  ;;  %v1311_v41 = vand.u32 2147483648, %v1305_v38  ;;  %vm1310_vm4 = vcmp.eq.f32.partialorder %v1305_v38, 0.0 }
 0x3ac   : > { %v4097_v39 = vpop.eup %4096 }
 0x3ad   : > { %v1307_v40 = vmul.f32 %v4097_v39, %v1305_v38 }
 0x3af   : > { %v1309_v42 = vsel %vm1308_vm12, %v1305_v38, %v1307_v40 }
 0x3b0   : > { %v1312_v43 = vsel %vm1310_vm4, %v1311_v41, %v1309_v42 }
 0x3b1   : > { %4098 = vrcp.f32 %v1312_v43 }
 0x3bb   : > { %v4099_v44 = vpop.eup %4098 }
 0x3bc   : > { %v1314_v46 = vmul.f32 %v4099_v44, %v4639_v10 }
 0x3be   : > { %v1321_v48 = vmul.f32 %v3507_v45, %v1314_v46 }
 0x3c0   : > { %v1328_v49 = vadd.f32 %v3508_v47, %v1321_v48 }
 0x3c2   : > { %3737 = vmatmul.mubr.msk.f32.vlgmr.msra.gmra.mrb[0].mxu0 %vm1293_vm11, %v1328_v49 }
 0x3c3   : > { %3741 = vmatprep.mubr.msk.f32.mxu0 %vm5133_vm5, %v4246_v19 }
 0x495   : > { %v4708_v55 = vpop.f32.mrb[0].mxu0 }
 0x496   : > { %v3738_v56 = vpop.f32.mrb[1].mxu0  ;;  %v1523_v57 = vmul.f32 %v1521_v50, %v4708_v55  ;;  %v1417_v58 = vmul.f32 %v1415_v51, %v4708_v55  ;;  %v1779_v61 = vmul.f32 %v1777_v59, %v4708_v55  ;;  %v1959_v62 = vmul.f32 %v1957_v52, %v4708_v55 }
 0x497   : > { %v2319_v63 = vmul.f32 %v2317_v54, %v4708_v55  ;;  %v2139_v0 = vmul.f32 %v2137_v53, %v4708_v55  ;;  %v2679_v2 = vmul.f32 %v2677_v1, %v4708_v55  ;;  %v2499_v3 = vmul.f32 %v2497_v60, %v4708_v55 }
 0x498   : > { %1525 = vrot.lane.b32.xlu1 %v1523_v57, %s4248_s6  ;;  %1419 = vrot.lane.b32.xlu0 %v1417_v58, %s4248_s6 }
 0x49c   : > { %1961 = vrot.lane.b32.xlu0 %v1959_v62, %s4248_s6  ;;  %1781 = vrot.lane.b32.xlu1 %v1779_v61, %s4248_s6 }
 0x4a0   : > { %2321 = vrot.lane.b32.xlu0 %v2319_v63, %s4248_s6  ;;  %2141 = vrot.lane.b32.xlu1 %v2139_v0, %s4248_s6 }
 0x4a4   : > { %2681 = vrot.lane.b32.xlu0 %v2679_v2, %s4248_s6  ;;  %2501 = vrot.lane.b32.xlu1 %v2499_v3, %s4248_s6  ;;  %s5140_s6 = sld [smem:[#allocation30_spill]] (!%p3549_p1) }
 0x4a8   : > { %4082 = vrot.lane.b32.xlu0 %v4081_v35, %s4249_s8  ;;  %4077 = vrot.lane.b32.xlu1 %v4076_v26, %s4249_s8 }
 0x50a   : > { %v1526_v4 = vpop.permute.xlu1 %1525  ;;  %v1420_v5 = vpop.permute.xlu0 %1419 }
 0x50b   : > { %3740 = vmatpush3.xpose.msk.msra.mxu0 %vm1293_vm11, %v1420_v5  ;;  %3745 = vmatpush3.xpose.msk.msra.mxu1 %vm1293_vm11, %v1526_v4 }
 0x50c   : > { %3759 = vmatprep.subr.mxu1 %v4246_v19  ;;  %3749 = vmatprep.subr.mxu0 %v4246_v19 }
 0x50e   : > { %3747 = vmatmul.mubr.msk.f32.vlgmr.msra.gmra.mrb[0].mxu1 %vm1293_vm11, %v4708_v55  ;;  %v1782_v7 = vpop.permute.xlu1 %1781  ;;  %3742 = vmatmul.mubr.msk.f32.vlgmr.msra.gmra.mrb[2].mxu0 %vm1293_vm11, %v4708_v55  ;;  %v1962_v8 = vpop.permute.xlu0 %1961 }
 0x50f   : > { %3760 = vmatpush3.xpose.msk.msra.mxu1 %vm1293_vm11, %v1782_v7  ;;  %3761 = vmatprep.mubr.msk.f32.mxu1 %vm5133_vm5, %v4246_v19 }
 0x510   : > { %3769 = vmatprep.subr.mxu1 %v4246_v19  ;;  %3751 = vmatprep.mubr.msk.f32.mxu0 %vm5133_vm5, %v4246_v19 }
 0x512   : > { %3762 = vmatmul.mubr.msk.f32.vlgmr.msra.gmra.mrb[2].mxu1 %vm1293_vm11, %v4708_v55  ;;  %v2142_v9 = vpop.permute.xlu1 %2141  ;;  %v2322_v10 = vpop.permute.xlu0 %2321 }
 0x513   : > { %3770 = vmatpush3.xpose.msk.msra.mxu1 %vm1293_vm11, %v1962_v8  ;;  %3771 = vmatprep.mubr.msk.f32.mxu1 %vm5133_vm5, %v4246_v19 }
 0x514   : > { %3779 = vmatprep.subr.mxu1 %v4246_v19 }
 0x516   : > { %3772 = vmatmul.mubr.msk.f32.vlgmr.msra.gmra.mrb[4].mxu1 %vm1293_vm11, %v4708_v55  ;;  %v2502_v11 = vpop.permute.xlu1 %2501  ;;  %v2682_v12 = vpop.permute.xlu0 %2681 }
 0x517   : > { %3780 = vmatpush3.xpose.msk.msra.mxu1 %vm1293_vm11, %v2142_v9  ;;  %3781 = vmatprep.mubr.msk.f32.mxu1 %vm5133_vm5, %v4246_v19 }
 0x518   : > { %3789 = vmatprep.subr.mxu1 %v4246_v19 }
 0x51a   : > { %3782 = vmatmul.mubr.msk.f32.vlgmr.msra.gmra.mrb[6].mxu1 %vm1293_vm11, %v4708_v55  ;;  %v4078_v58 = vpop.permute.xlu1 %4077  ;;  %v4083_v28 = vpop.permute.xlu0 %4082 }
 0x51b   : > { %3790 = vmatpush3.xpose.msk.msra.mxu1 %vm1293_vm11, %v2322_v10  ;;  %3791 = vmatprep.mubr.msk.f32.mxu1 %vm5133_vm5, %v4246_v19  ;;  %v4079_v59 = vunpack.i.l.bf16 %v4078_v58  ;;  %v4080_v60 = vunpack.i.h.bf16 %v4078_v58 }
 0x51c   : > { %3799 = vmatprep.subr.mxu1 %v4246_v19 }
 0x51d   : > { %v1615_v61 = vmul.f32 %v4079_v59, %v4708_v55  ;;  %v1513_v62 = vmul.f32 %v4080_v60, %v4708_v55 }
 0x51e   : > { %3792 = vmatmul.mubr.msk.f32.vlgmr.msra.gmra.mrb[8].mxu1 %vm1293_vm11, %v4708_v55 }
 0x51f   : > { %3800 = vmatpush3.xpose.msk.msra.mxu1 %vm1293_vm11, %v2502_v11  ;;  %3801 = vmatprep.mubr.msk.f32.mxu1 %vm5133_vm5, %v4246_v19 }
 0x520   : > { %3809 = vmatprep.subr.mxu1 %v4246_v19 }
 0x522   : > { %3802 = vmatmul.mubr.msk.f32.vlgmr.msra.gmra.mrb[10].mxu1 %vm1293_vm11, %v4708_v55 }
 0x523   : > { %3810 = vmatpush3.xpose.msk.msra.mxu1 %vm1293_vm11, %v2682_v12  ;;  %3811 = vmatprep.mubr.msk.f32.mxu1 %vm5133_vm5, %v4246_v19 }
 0x524   : > { %3945 = vmatprep.subr.bf16.mxu1 %v4244_v16 }
 0x526   : > { %3812 = vmatmul.mubr.msk.f32.vlgmr.msra.gmra.mrb[12].mxu1 %vm1293_vm11, %v4708_v55 }
 0x527   : > { %3873 = vmatprep.mubr.msk.f32.mxu1 %vm5133_vm5, %v4246_v19 }
 0x5e1   : > { %v1492_v13 = vpop.f32.mrb[2].mxu0  ;;  %v1595_v14 = vpop.f32.mrb[0].mxu1 }
 0x5e2   : > { %v1496_v17 = vmul.f32 0.5, %v1492_v13  ;;  %v1599_v18 = vmul.f32 0.5, %v1595_v14  ;;  %v3743_v20 = vpop.f32.mrb[3].mxu0  ;;  %v3748_v21 = vpop.f32.mrb[1].mxu1 }
 0x5e4   : > { %v1600_v22 = vadd.f32 %v1599_v18, %v1290_v15  ;;  %v1497_v23 = vadd.f32 %v1496_v17, %v1290_v15 }
 0x5e5   : > { %v1851_v24 = vpop.f32.mrb[2].mxu1 }
 0x5e6   : > { %v1855_v25 = vmul.f32 0.5, %v1851_v24  ;;  %v3763_v26 = vpop.f32.mrb[3].mxu1  ;;  %v1601_v32 = vsel %vm1498_vm6, %v1600_v22, -inf  ;;  %v1499_v34 = vsel %vm1498_vm6, %v1497_v23, -inf }
 0x5e7   : > { %1602 = vmax.xlane.f32.xlu1 %v1601_v32  ;;  %1500 = vmax.xlane.f32.xlu0 %v1499_v34  ;;  %v4084_v34 = vunpack.i.l.bf16 %v4083_v28 }
 0x5e8   : > { %v1856_v35 = vadd.f32 %v1855_v25, %v1290_v15 }
 0x5e9   : > { %v2031_v36 = vpop.f32.mrb[4].mxu1 }
 0x5ea   : > { %v2035_v37 = vmul.f32 0.5, %v2031_v36  ;;  %v3773_v38 = vpop.f32.mrb[5].mxu1  ;;  %v1857_v39 = vsel %vm1498_vm6, %v1856_v35, -inf  ;;  %v1871_v36 = vmul.f32 %v4084_v34, %v4708_v55 }
 0x5eb   : > { %1858 = vmax.xlane.f32.xlu0 %v1857_v39 }
 0x5ec   : > { %v2036_v40 = vadd.f32 %v2035_v37, %v1290_v15 }
 0x5ed   : > { %v2211_v41 = vpop.f32.mrb[6].mxu1 }
 0x5ee   : > { %v2215_v42 = vmul.f32 0.5, %v2211_v41  ;;  %v3783_v43 = vpop.f32.mrb[7].mxu1  ;;  %v2037_v44 = vsel %vm1498_vm6, %v2036_v40, -inf }
 0x5ef   : > { %2038 = vmax.xlane.f32.xlu1 %v2037_v44 }
 0x5f0   : > { %v2216_v45 = vadd.f32 %v2215_v42, %v1290_v15 }
 0x5f1   : > { %v2391_v46 = vpop.f32.mrb[8].mxu1 }
 0x5f2   : > { %v3793_v47 = vpop.f32.mrb[9].mxu1  ;;  %v2217_v48 = vsel %vm1498_vm6, %v2216_v45, -inf  ;;  %v2395_v63 = vmul.f32 0.5, %v2391_v46 }
 0x5f3   : > { %2218 = vmax.xlane.f32.xlu0 %v2217_v48 }
 0x5f4   : > { %v2396_v0 = vadd.f32 %v2395_v63, %v1290_v15 }
 0x5f5   : > { %v2571_v49 = vpop.f32.mrb[10].mxu1 }
 0x5f6   : > { %v2575_v50 = vmul.f32 0.5, %v2571_v49  ;;  %v3803_v51 = vpop.f32.mrb[11].mxu1  ;;  %v2397_v1 = vsel %vm1498_vm6, %v2396_v0, -inf }
 0x5f8   : > { %v4779_v52 = vadd.f32 %v2575_v50, %v1290_v15 }
 0x5f9   : > { %v2751_v53 = vpop.f32.mrb[12].mxu1 }
 0x5fa   : > { %v2755_v54 = vmul.f32 0.5, %v2751_v53  ;;  %v3813_v56 = vpop.f32.mrb[13].mxu1  ;;  %v2577_v2 = vsel %vm1498_vm6, %v4779_v52, -inf }
 0x5fc   : > { %v4781_v57 = vadd.f32 %v2755_v54, %v1290_v15 }
 0x5fe   : > { %v2757_v27 = vsel %vm1498_vm6, %v4781_v57, -inf }
 0x600   : > { %4087 = vrot.lane.b32.xlu1 %v4086_v29, %s4249_s8 }
 0x609   : > { %1617 = vrot.lane.b32.xlu0 %v1615_v61, %s4249_s8 }
 0x60d   : > { %1694 = vrot.lane.b32.xlu0 %v1513_v62, %s4249_s8 }
 0x624   : > { %2398 = vmax.xlane.f32.xlu1 %v2397_v1 }
 0x62c   : > { %2578 = vmax.xlane.f32.xlu0 %v2577_v2 }
 0x630   : > { %2758 = vmax.xlane.f32.xlu0 %v2757_v27 }
 0x635   : > { %4092 = vrot.lane.b32.xlu1 %v4091_v33, %s4249_s8 }
 0x674   : > { %v1603_v29 = vpop.xlane.xlu1 %1602  ;;  %v1501_v3 = vpop.xlane.xlu0 %1500 }
 0x675   : > { %v1604_v4 = vsub.f32 %v1600_v22, %v1603_v29  ;;  %v1502_v5 = vsub.f32 %v1497_v23, %v1501_v3 }
 0x677   : > { %v1605_v7 = vmul.f32 1.442695, %v1604_v4  ;;  %v1503_v8 = vmul.f32 1.442695, %v1502_v5 }
 0x678   : > { %v1859_v9 = vpop.xlane.xlu0 %1858 }
 0x679   : > { %4100 = vpow2.f32 %v1605_v7  ;;  %v1860_v10 = vsub.f32 %v1856_v35, %v1859_v9  ;;  %v4085_v35 = vunpack.i.h.bf16 %v4083_v28 }
 0x67a   : > { %4102 = vpow2.f32 %v1503_v8 }
 0x67b   : > { %v1861_v11 = vmul.f32 1.442695, %v1860_v10  ;;  %v2051_v37 = vmul.f32 %v4085_v35, %v4708_v55 }
 0x67c   : > { %v2039_v12 = vpop.xlane.xlu1 %2038 }
 0x67d   : > { %4104 = vpow2.f32 %v1861_v11  ;;  %v2040_v13 = vsub.f32 %v2036_v40, %v2039_v12 }
 0x67f   : > { %v2041_v14 = vmul.f32 1.442695, %v2040_v13 }
 0x680   : > { %v2219_v15 = vpop.xlane.xlu0 %2218  ;;  %v4088_v38 = vpop.permute.xlu1 %4087 }
 0x681   : > { %4106 = vpow2.f32 %v2041_v14  ;;  %v2220_v30 = vsub.f32 %v2216_v45, %v2219_v15  ;;  %v4089_v56 = vunpack.i.l.bf16 %v4088_v38 }
 0x683   : > { %v4800_v31 = vpop.eup %4100  ;;  %v2221_v33 = vmul.f32 1.442695, %v2220_v30  ;;  %v2231_v58 = vmul.f32 %v4089_v56, %v4708_v55 }
 0x684   : > { %v4802_v17 = vpop.eup %4102  ;;  %v1618_v18 = vpop.permute.xlu0 %1617  ;;  %v1607_v20 = vsel %vm1498_vm6, %v4800_v31, 0.0 }
 0x685   : > { %4108 = vpow2.f32 %v2221_v33  ;;  %1608 = vadd.xlane.f32.xlu1 %v1607_v20  ;;  %v1505_v21 = vsel %vm1498_vm6, %v4802_v17, 0.0  ;;  %3750 = vmatpush3.msra.mxu0 %v1618_v18 }
 0x686   : > { %1506 = vadd.xlane.f32.xlu0 %v1505_v21  ;;  %3754 = vmatprep.subr.mxu0 %v4246_v19 }
 0x687   : > { %v4809_v22 = vpop.eup %4104 }
 0x688   : > { %v1863_v23 = vsel %vm1498_vm6, %v4809_v22, 0.0  ;;  %v1695_v42 = vpop.permute.xlu0 %1694 }
 0x68a   : > { %1864 = vadd.xlane.f32.xlu0 %v1863_v23 }
 0x68b   : > { %v4813_v24 = vpop.eup %4106 }
 0x68c   : > { %v2043_v25 = vsel %vm1498_vm6, %v4813_v24, 0.0 }
 0x68e   : > { %2044 = vadd.xlane.f32.xlu0 %v2043_v25  ;;  %v2850_v25 = vld [vmem:[%s5135_s1] sm:$0xff] }
 0x68f   : > { %v4817_v26 = vpop.eup %4108 }
 0x690   : > { %v2223_v32 = vsel %vm1498_vm6, %v4817_v26, 0.0 }
 0x691   : > { %2224 = vadd.xlane.f32.xlu1 %v2223_v32 }
 0x6a2   : > { %1873 = vrot.lane.b32.xlu1 %v1871_v36, %s4249_s8  ;;  %v2852_v36 = vld [vmem:[%s5135_s1 + $0x10] sm:$0xff] }
 0x6a4   : > { %2053 = vrot.lane.b32.xlu0 %v2051_v37, %s4249_s8  ;;  %v2853_v37 = vld [vmem:[%s5135_s1 + $0x18] sm:$0xff] }
 0x6b1   : > { %v2399_v39 = vpop.xlane.xlu1 %2398 }
 0x6b2   : > { %v2400_v40 = vsub.f32 %v2396_v0, %v2399_v39 }
 0x6b4   : > { %v2401_v41 = vmul.f32 1.442695, %v2400_v40 }
 0x6b5   : > { %v4093_v59 = vpop.permute.xlu1 %4092 }
 0x6b6   : > { %4110 = vpow2.f32 %v2401_v41  ;;  %v4094_v61 = vunpack.i.l.bf16 %v4093_v59  ;;  %v4095_v62 = vunpack.i.h.bf16 %v4093_v59 }
 0x6b8   : > { %v2591_v63 = vmul.f32 %v4094_v61, %v4708_v55  ;;  %v2771_v0 = vmul.f32 %v4095_v62, %v4708_v55 }
 0x6b9   : > { %v2579_v43 = vpop.xlane.xlu0 %2578 }
 0x6ba   : > { %v2580_v44 = vsub.f32 %v4779_v52, %v2579_v43 }
 0x6bc   : > { %v2581_v45 = vmul.f32 1.442695, %v2580_v44 }
 0x6bd   : > { %v2759_v46 = vpop.xlane.xlu0 %2758 }
 0x6be   : > { %4112 = vpow2.f32 %v2581_v45  ;;  %v2760_v47 = vsub.f32 %v4781_v57, %v2759_v46  ;;  %v4090_v57 = vunpack.i.h.bf16 %v4088_v38  ;;  %v3937_v38 = vpack.c.bf16 %v2853_v37, %v2852_v36 }
 0x6c0   : > { %v4827_v48 = vpop.eup %4110  ;;  %v2761_v49 = vmul.f32 1.442695, %v2760_v47  ;;  %v2411_v60 = vmul.f32 %v4090_v57, %v4708_v55  ;;  %v3065_v57 = vld [vmem:[%s4508_s27] sm:$0xff] }
 0x6c1   : > { %v2403_v50 = vsel %vm1498_vm6, %v4827_v48, 0.0 }
 0x6c2   : > { %4114 = vpow2.f32 %v2761_v49 }
 0x6c3   : > { %2404 = vadd.xlane.f32.xlu0 %v2403_v50 }
 0x6c8   : > { %v4831_v51 = vpop.eup %4112 }
 0x6c9   : > { %v2583_v53 = vsel %vm1498_vm6, %v4831_v51, 0.0 }
 0x6ca   : > { %2584 = vadd.xlane.f32.xlu0 %v2583_v53  ;;  %v2973_v53 = vld [vmem:[%s4498_s11 + $0x8] sm:$0xff] }
 0x6cc   : > { %v4835_v52 = vpop.eup %4114 }
 0x6cd   : > { %v2763_v54 = vsel %vm1498_vm6, %v4835_v52, 0.0 }
 0x6ce   : > { %2764 = vadd.xlane.f32.xlu1 %v2763_v54  ;;  %v2975_v54 = vld [vmem:[%s4498_s11 + $0x18] sm:$0xff] }
 0x6e0   : > { %2233 = vrot.lane.b32.xlu0 %v2231_v58, %s4249_s8  ;;  %v3066_v58 = vld [vmem:[%s4508_s27 + $0x8] sm:$0xff] }
 0x6e1   : > { %v3946_v59 = vpack.c.bf16 %v3066_v58, %v3065_v57  ;;  %v3203_v57 = vld [vmem:[%s5139_s22 + $0x10] sm:$0xff] (!%p3549_p1)  ;;  %v4250_v58 = vmov (!%p3549_p1), 0.0|0.0  }
 0x6e3   : > { %3947 = vmatpush3.bf16.msra.mxu1 %v3946_v59 }
 0x6e4   : > { %2413 = vrot.lane.b32.xlu0 %v2411_v60, %s4249_s8  ;;  %3948 = vmatprep.subr.bf16.mxu1 %v4244_v16 }
 0x6e8   : > { %2593 = vrot.lane.b32.xlu0 %v2591_v63, %s4249_s8 }
 0x6ec   : > { %2773 = vrot.lane.b32.xlu0 %v2771_v0, %s4249_s8  ;;  %s5137_s8 = scalar_lea.vmem %s5057_s17, %s4457_s5  ;;  %s5142_s5 = sld [smem:[#allocation33_spill]] (!%p3549_p1) }
 0x712   : > { %v1609_v1 = vpop.xlane.xlu1 %1608 }
 0x713   : > { %4116 = vrcp.f32 %v1609_v1  ;;  %v1507_v2 = vpop.xlane.xlu0 %1506 }
 0x714   : > { %4118 = vrcp.f32 %v1507_v2 }
 0x717   : > { %v1865_v29 = vpop.xlane.xlu0 %1864 }
 0x718   : > { %4120 = vrcp.f32 %v1865_v29  ;;  %v3544_v29 = vld [vmem:[%s903_s24] ss:$0 sm:$0xff] }
 0x71b   : > { %v2045_v5 = vpop.xlane.xlu0 %2044 }
 0x71c   : > { %4122 = vrcp.f32 %v2045_v5 }
 0x71d   : > { %v4117_v27 = vpop.eup %4116 }
 0x71e   : > { %v1611_v28 = vmul.f32 %v4117_v27, %v4800_v31  ;;  %v2225_v3 = vpop.xlane.xlu1 %2224  ;;  %v4119_v55 = vpop.eup %4118 }
 0x71f   : > { %v1509_v4 = vmul.f32 %v4119_v55, %v4802_v17  ;;  %v2054_v10 = vpop.permute.xlu0 %2053  ;;  %4124 = vrcp.f32 %v2225_v3  ;;  %v3545_v55 = vld [vmem:[%s906_s0] ss:$0 sm:$0xff] }
 0x720   : > { %3752 = vmatmul.mubr.msk.f32.vlgmr.msra.gmra.mrb[4].mxu0 %vm1498_vm6, %v1611_v28 }
 0x721   : > { %3755 = vmatpush3.msra.mxu0 %v1695_v42  ;;  %3756 = vmatprep.mubr.msk.f32.mxu0 %vm5133_vm5, %v4246_v19  ;;  %v3543_v42 = vld [vmem:[%s5136_s23] ss:$0 sm:$0xff] }
 0x722   : > { %3764 = vmatprep.subr.mxu0 %v4246_v19  ;;  %v1874_v7 = vpop.permute.xlu1 %1873  ;;  %v4121_v8 = vpop.eup %4120 }
 0x723   : > { %v1867_v9 = vmul.f32 %v4121_v8, %v4809_v22  ;;  %v3068_v8 = vld [vmem:[%s4508_s27 + $0x18] sm:$0xff] }
 0x726   : > { %v4123_v11 = vpop.eup %4122 }
 0x727   : > { %v2047_v12 = vmul.f32 %v4123_v11, %v4813_v24  ;;  %v3070_v11 = vld [vmem:[%s4508_s27 + $0x28] sm:$0xff] }
 0x728   : > { %3757 = vmatmul.mubr.msk.f32.vlgmr.msra.gmra.mrb[4].mxu0 %vm1498_vm6, %v1509_v4 }
 0x729   : > { %3765 = vmatpush3.msra.mxu0 %v1874_v7  ;;  %3766 = vmatprep.mubr.msk.f32.mxu0 %vm5133_vm5, %v4246_v19  ;;  %v4125_v15 = vpop.eup %4124  ;;  %v3067_v7 = vld [vmem:[%s4508_s27 + $0x10] sm:$0xff] }
 0x72a   : > { %3774 = vmatprep.subr.mxu0 %v4246_v19  ;;  %v2227_v30 = vmul.f32 %v4125_v15, %v4817_v26  ;;  %v2851_v26 = vld [vmem:[%s5135_s1 + $0x8] sm:$0xff] }
 0x72b   : > { %v3934_v34 = vpack.c.bf16 %v2851_v26, %v2850_v25  ;;  %v3080_v25 = vld [vmem:[%s4508_s27 + $0x78] sm:$0xff] }
 0x730   : > { %3767 = vmatmul.mubr.msk.f32.vlgmr.msra.gmra.mrb[4].mxu0 %vm1498_vm6, %v1867_v9  ;;  %v3949_v9 = vpack.c.bf16 %v3068_v8, %v3067_v7 }
 0x731   : > { %3775 = vmatpush3.msra.mxu0 %v2054_v10  ;;  %3776 = vmatprep.mubr.msk.f32.mxu0 %vm5133_vm5, %v4246_v19  ;;  %v3069_v10 = vld [vmem:[%s4508_s27 + $0x20] sm:$0xff] }
 0x732   : > { %3784 = vmatprep.subr.mxu0 %v4246_v19  ;;  %3950 = vmatpush3.bf16.msra.mxu1 %v3949_v9 }
 0x733   : > { %3951 = vmatprep.subr.bf16.mxu1 %v4244_v16 }
 0x738   : > { %3777 = vmatmul.mubr.msk.f32.vlgmr.msra.gmra.mrb[4].mxu0 %vm1498_vm6, %v2047_v12  ;;  %v3952_v12 = vpack.c.bf16 %v3070_v11, %v3069_v10  ;;  %v3552_v10 = vld [vmem:[%s5142_s5] ss:$0 sm:$0xff] (!%p3549_p1) }
 0x739   : > { %3786 = vmatprep.mubr.msk.f32.mxu0 %vm5133_vm5, %v4246_v19 }
 0x73a   : > { %3953 = vmatpush3.bf16.msra.mxu1 %v3952_v12 }
 0x73b   : > { %3954 = vmatprep.subr.bf16.mxu1 %v4244_v16 }
 0x750   : > { %v2405_v13 = vpop.xlane.xlu0 %2404 }
 0x751   : > { %4126 = vrcp.f32 %v2405_v13  ;;  %v3071_v13 = vld [vmem:[%s4508_s27 + $0x30] sm:$0xff] }
 0x757   : > { %v2585_v14 = vpop.xlane.xlu0 %2584 }
 0x758   : > { %4128 = vrcp.f32 %v2585_v14  ;;  %v3072_v14 = vld [vmem:[%s4508_s27 + $0x38] sm:$0xff] }
 0x759   : > { %v3955_v15 = vpack.c.bf16 %v3072_v14, %v3071_v13 }
 0x75b   : > { %v2234_v31 = vpop.permute.xlu0 %2233  ;;  %v4127_v17 = vpop.eup %4126  ;;  %3956 = vmatpush3.bf16.msra.mxu1 %v3955_v15 }
 0x75c   : > { %3785 = vmatpush3.msra.mxu0 %v2234_v31  ;;  %v2407_v18 = vmul.f32 %v4127_v17, %v4827_v48  ;;  %v2765_v20 = vpop.xlane.xlu1 %2764  ;;  %v3074_v31 = vld [vmem:[%s4508_s27 + $0x48] sm:$0xff]  ;;  %3957 = vmatprep.subr.bf16.mxu1 %v4244_v16  ;;  %v3075_v17 = vld [vmem:[%s4508_s27 + $0x50] sm:$0xff] }
 0x75d   : > { %3787 = vmatmul.mubr.msk.f32.vlgmr.msra.gmra.mrb[4].mxu0 %vm1498_vm6, %v2227_v30  ;;  %3794 = vmatprep.subr.mxu0 %v4246_v19  ;;  %4130 = vrcp.f32 %v2765_v20  ;;  %v3073_v30 = vld [vmem:[%s4508_s27 + $0x40] sm:$0xff] }
 0x75e   : > { %3796 = vmatprep.mubr.msk.f32.mxu0 %vm5133_vm5, %v4246_v19 }
 0x75f   : > { %v2414_v33 = vpop.permute.xlu0 %2413 }
 0x760   : > { %3795 = vmatpush3.msra.mxu0 %v2414_v33  ;;  %v3958_v33 = vpack.c.bf16 %v3074_v31, %v3073_v30 }
 0x761   : > { %3804 = vmatprep.subr.mxu0 %v4246_v19 }
 0x762   : > { %v4129_v22 = vpop.eup %4128  ;;  %3959 = vmatpush3.bf16.msra.mxu1 %v3958_v33 }
 0x763   : > { %v2594_v21 = vpop.permute.xlu0 %2593  ;;  %v2587_v23 = vmul.f32 %v4129_v22, %v4831_v51  ;;  %v2972_v51 = vld [vmem:[%s4498_s11] sm:$0xff]  ;;  %3960 = vmatprep.subr.bf16.mxu1 %v4244_v16  ;;  %v3078_v22 = vld [vmem:[%s4508_s27 + $0x68] sm:$0xff] }
 0x765   : > { %3797 = vmatmul.mubr.msk.f32.vlgmr.msra.gmra.mrb[4].mxu0 %vm1498_vm6, %v2407_v18  ;;  %v3076_v18 = vld [vmem:[%s4508_s27 + $0x58] sm:$0xff] }
 0x766   : > { %3805 = vmatpush3.msra.mxu0 %v2594_v21  ;;  %3806 = vmatprep.mubr.msk.f32.mxu0 %vm5133_vm5, %v4246_v19  ;;  %v3961_v20 = vpack.c.bf16 %v3076_v18, %v3075_v17  ;;  %v3077_v21 = vld [vmem:[%s4508_s27 + $0x60] sm:$0xff] }
 0x767   : > { %3814 = vmatprep.subr.mxu0 %v4246_v19  ;;  %v2774_v24 = vpop.permute.xlu0 %2773  ;;  %v4131_v32 = vpop.eup %4130 }
 0x768   : > { %v2767_v35 = vmul.f32 %v4131_v32, %v4835_v52  ;;  %v3940_v52 = vpack.c.bf16 %v2973_v53, %v2972_v51  ;;  %3962 = vmatpush3.bf16.msra.mxu1 %v3961_v20  ;;  %v3546_v32 = vld [vmem:[%s5137_s8] ss:$0 sm:$0xff]  ;;  %s5141_s8 = sld [smem:[#allocation31_spill]] (!%p3549_p1) }
 0x769   : > { %3963 = vmatprep.subr.bf16.mxu1 %v4244_v16 }
 0x76d   : > { %3807 = vmatmul.mubr.msk.f32.vlgmr.msra.gmra.mrb[4].mxu0 %vm1498_vm6, %v2587_v23  ;;  %v3964_v23 = vpack.c.bf16 %v3078_v22, %v3077_v21 }
 0x76e   : > { %3815 = vmatpush3.msra.mxu0 %v2774_v24  ;;  %3816 = vmatprep.mubr.msk.f32.mxu0 %vm5133_vm5, %v4246_v19  ;;  %v3079_v24 = vld [vmem:[%s4508_s27 + $0x70] sm:$0xff]  ;;  %v3551_v7 = vld [vmem:[%s5141_s8] ss:$0 sm:$0xff] (!%p3549_p1) }
 0x76f   : > { %3933 = vmatprep.subr.bf16.mxu0 %v4244_v16  ;;  %3965 = vmatpush3.bf16.msra.mxu1 %v3964_v23  ;;  %v3967_v26 = vpack.c.bf16 %v3080_v25, %v3079_v24 }
 0x770   : > { %3966 = vmatprep.subr.bf16.mxu1 %v4244_v16 }
 0x773   : > { %3968 = vmatpush3.bf16.msra.mxu1 %v3967_v26 }
 0x775   : > { %3817 = vmatmul.mubr.msk.f32.vlgmr.msra.gmra.mrb[4].mxu0 %vm1498_vm6, %v2767_v35 }
 0x776   : > { %3935 = vmatpush3.bf16.msra.mxu0 %v3934_v34  ;;  %3827 = vmatprep.mubr.msk.f32.mxu0 %vm5133_vm5, %v4246_v19 }
 0x777   : > { %3936 = vmatprep.subr.bf16.mxu0 %v4244_v16 }
 0x77a   : > { %3938 = vmatpush3.bf16.msra.mxu0 %v3937_v38 }
 0x77b   : > { %3939 = vmatprep.subr.bf16.mxu0 %v4244_v16 }
 0x848   : > { %v2845_v39 = vpop.f32.mrb[4].mxu0 }
 0x849   : > { %v3818_v40 = vpop.f32.mrb[5].mxu0  ;;  %3828 = vmatmul.mubr.msk.f32.vlgmr.msra.gmra.mrb[6].mxu0 %vm1293_vm11, %v2845_v39 }
 0x84a   : > { %3838 = vmatprep.mubr.msk.f32.mxu0 %vm5133_vm5, %v4246_v19  ;;  %3941 = vmatpush3.bf16.msra.mxu0 %v3940_v52 }
 0x84b   : > { %3942 = vmatprep.subr.bf16.mxu0 %v4244_v16 }
 0x91c   : > { %v2923_v41 = vpop.f32.mrb[6].mxu0 }
 0x91d   : > { %v2927_v43 = vadd.f32 %v2923_v41, %v4634_v6  ;;  %v3829_v44 = vpop.f32.mrb[7].mxu0  ;;  %v2974_v6 = vld [vmem:[%s4498_s11 + $0x10] sm:$0xff] }
 0x91e   : > { %v3943_v56 = vpack.c.bf16 %v2975_v54, %v2974_v6 }
 0x91f   : > { %v4901_v45 = vadd.f32 %v3543_v42, %v2927_v43 }
 0x920   : > { %3944 = vmatpush3.bf16.msra.mxu0 %v3943_v56  ;;  %v3202_v56 = vld [vmem:[%s5139_s22 + $0x8] sm:$0xff] (!%p3549_p1) }
 0x921   : > { %v2938_v46 = vsel %vm1293_vm11, %v4901_v45, 0.0  ;;  %3969 = vmatprep.subr.bf16.mxu0 (!%p3549_p1), %v4250_v58 }
 0x922   : > { %2939 = vadd.xlane.f32.xlu1 %v2938_v46 }
 0x9af   : > { %v2940_v47 = vpop.xlane.xlu1 %2939 }
 0x9b0   : > { %v2941_v19 = vmul.f32 0.03125, %v2940_v47  ;;  %v3548_v47 = vld [vmem:[%s922_s26] ss:$0 sm:$0xff]  ;;  %s5143_s26 = scalar_lea.vmem (!%p3549_p1), [#allocation3], %s4452_s2 }
 0x9b2   : > { %v2942_v48 = vsub.f32 %v4901_v45, %v2941_v19 }
 0x9b4   : > { %v2943_v49 = vmul.f32 %v2942_v48, %v2942_v48 }
 0x9b6   : > { %v2944_v50 = vsel %vm1293_vm11, %v2943_v49, 0.0 }
 0x9b7   : > { %2945 = vadd.xlane.f32.xlu0 %v2944_v50 }
 0xa44   : > { %v2946_v60 = vpop.xlane.xlu0 %2945 }
 0xa45   : > { %v2947_v61 = vmul.f32 0.03125, %v2946_v60  ;;  %v3204_v60 = vld [vmem:[%s5139_s22 + $0x18] sm:$0xff] (!%p3549_p1) }
 0xa47   : > { %v2948_v62 = vadd.f32 1e-05, %v2947_v61  ;;  %v4252_v61 = vmov (!%p3549_p1), 0.0  }
 0xa49   : > { %4132 = vrsqrt.f32 %v2948_v62  ;;  %vm2951_vm7 = vcmp.eq.f32.partialorder %v2948_v62, inf  ;;  %v2954_v1 = vand.u32 2147483648, %v2948_v62  ;;  %vm2953_vm8 = vcmp.eq.f32.partialorder %v2948_v62, 0.0 }
 0xa53   : > { %v4133_v63 = vpop.eup %4132 }
 0xa54   : > { %v2950_v0 = vmul.f32 %v4133_v63, %v2948_v62 }
 0xa56   : > { %v2952_v2 = vsel %vm2951_vm7, %v2948_v62, %v2950_v0  ;;  %v3973_v62 = vpack.c.bf16 (!%p3549_p1), %v3204_v60, %v3203_v57 }
 0xa57   : > { %v2955_v27 = vsel %vm2953_vm8, %v2954_v1, %v2952_v2 }
 0xa58   : > { %4134 = vrcp.f32 %v2955_v27 }
 0xa62   : > { %v4135_v28 = vpop.eup %4134 }
 0xa63   : > { %v2957_v3 = vmul.f32 %v4135_v28, %v2942_v48 }
 0xa65   : > { %v2964_v4 = vmul.f32 %v3544_v29, %v2957_v3 }
 0xa67   : > { %v2971_v5 = vadd.f32 %v3545_v55, %v2964_v4  ;;  %v3550_v4 = vld [vmem:[%s5140_s6] ss:$0 sm:$0xff] (!%p3549_p1) }
 0xa69   : > { %3839 = vmatmul.mubr.msk.f32.vlgmr.msra.gmra.mrb[8].mxu0 %vm1293_vm11, %v2971_v5 }
 0xa6a   : > { %3884 = vmatprep.mubr.msk.f32.mxu0 (!%p3549_p1), %vm4251_vm9, %v4252_v61 }
 0xb3c   : > { %v3052_v34 = vpop.f32.mrb[8].mxu0 }
 0xb3d   : > { %v3053_v35 = vadd.f32 %v3546_v32, %v3052_v34  ;;  %v3840_v36 = vpop.f32.mrb[9].mxu0 }
 0xb3f   : > { %v3057_v37 = vmul.f32 0.044715, %v3053_v35  ;;  %v3056_v43 = vmul.f32 0.5, %v3053_v35 }
 0xb41   : > { %v3058_v38 = vmul.f32 %v3057_v37, %v3053_v35 }
 0xb43   : > { %v3059_v39 = vmul.f32 %v3058_v38, %v3053_v35 }
 0xb45   : > { %v3060_v40 = vadd.f32 %v3059_v39, %v3053_v35 }
 0xb47   : > { %v3061_v41 = vmul.f32 0.7978846, %v3060_v40 }
 0xb49   : > { %4136 = vtanh.f32 %v3061_v41 }
 0xb53   : > { %v4137_v42 = vpop.eup %4136 }
 0xb54   : > { %v3063_v44 = vadd.f32 1.0, %v4137_v42 }
 0xb56   : > { %v3064_v16 = vmul.f32 %v3063_v44, %v3056_v43 }
 0xb58   : > { %3874 = vmatmul.mubr.f32.vlgmr.msra.gmra.mrb[14].mxu1 %v3064_v16 }
 0xc2a   : > { %3164 = sbr.rel (%p3549_p1) target bundleno = 3663 (0xe4f), region = 124 }
 0xc2b   : > { %v3147_v46 = vpop.f32.mrb[14].mxu1 }
 0xc2c   : > { %v3151_v19 = vadd.f32 %v3147_v46, %v4901_v45  ;;  %v3875_v48 = vpop.f32.mrb[15].mxu1  ;;  %v3201_v45 = vld [vmem:[%s5138_s29] sm:$0xff] (!%p3549_p1) }
 0xc2d   : > { %v3970_v59 = vpack.c.bf16 (!%p3549_p1), %v3202_v56, %v3201_v45 }
 0xc2e   : > { %v3159_v49 = vadd.f32 %v3548_v47, %v3151_v19 }
 0xc2f   : > { %3971 = vmatpush3.bf16.msra.mxu0 (!%p3549_p1), %v3970_v59 }
 0xc30   : > { %3160 = vst.msk [vmem:[#allocation2] sm:$0xff] %vm1293_vm11, %v3159_v49  ;;  %v3167_v50 = vsel (!%p3549_p1), %vm1293_vm11, %v3159_v49, 0.0  ;;  %3972 = vmatprep.subr.bf16.mxu0 (!%p3549_p1), %v4250_v58 }
 0xc31   : > { %3168 = vadd.xlane.f32.xlu0 %v3167_v50 }
 0xc33   : > { %3974 = vmatpush3.bf16.msra.mxu0 %v3973_v62 }
 0xcbe   : > { %v3169_v51 = vpop.xlane.xlu0 %3168 }
 0xcbf   : > { %v3170_v53 = vmul.f32 0.03125, %v3169_v51 }
 0xcc1   : > { %v3171_v6 = vsub.f32 %v3159_v49, %v3170_v53 }
 0xcc3   : > { %v3172_v52 = vmul.f32 %v3171_v6, %v3171_v6 }
 0xcc5   : > { %v3173_v54 = vsel %vm1293_vm11, %v3172_v52, 0.0 }
 0xcc6   : > { %3174 = vadd.xlane.f32.xlu0 %v3173_v54 }
 0xd53   : > { %v3175_v63 = vpop.xlane.xlu0 %3174 }
 0xd54   : > { %v3176_v0 = vmul.f32 0.03125, %v3175_v63 }
 0xd56   : > { %v3177_v1 = vadd.f32 1e-05, %v3176_v0 }
 0xd58   : > { %4138 = vrsqrt.f32 %v3177_v1  ;;  %vm3180_vm10 = vcmp.eq.f32.partialorder %v3177_v1, inf  ;;  %v3183_v28 = vand.u32 2147483648, %v3177_v1  ;;  %vm3182_vm13 = vcmp.eq.f32.partialorder %v3177_v1, 0.0 }
 0xd62   : > { %v4139_v2 = vpop.eup %4138 }
 0xd63   : > { %v3179_v27 = vmul.f32 %v4139_v2, %v3177_v1 }
 0xd65   : > { %v3181_v29 = vsel %vm3180_vm10, %v3177_v1, %v3179_v27 }
 0xd66   : > { %v3184_v3 = vsel %vm3182_vm13, %v3183_v28, %v3181_v29 }
 0xd67   : > { %4140 = vrcp.f32 %v3184_v3 }
 0xd71   : > { %v4141_v55 = vpop.eup %4140 }
 0xd72   : > { %v3186_v5 = vmul.f32 %v4141_v55, %v3171_v6 }
 0xd74   : > { %v3193_v8 = vmul.f32 %v3550_v4, %v3186_v5 }
 0xd76   : > { %v3200_v9 = vadd.f32 %v3551_v7, %v3193_v8 }
 0xd78   : > { %3885 = vmatmul.mubr.msk.f32.vlgmr.msra.gmra.mrb[0].mxu0 %vm1293_vm11, %v3200_v9 }
 0xe4b   : > { %v3281_v11 = vpop.f32.mrb[0].mxu0 }
 0xe4c   : > { %v3282_v12 = vadd.f32 %v3552_v10, %v3281_v11  ;;  %v3886_v13 = vpop.f32.mrb[1].mxu0 }
 0xe4e   : > { %3285 = vst [vmem:[%s5143_s26] sm:$0xff] %v3282_v12 }
 0xe4f PF: > { %s5144_s29 = sld [smem:[#allocation9_spill]]  ;;  %s5147_s11 = sld [smem:[#allocation34_spill]] }
 0xe50   : > { %s5145_s1 = sld [smem:[#allocation7_spill]]  ;;  %s5148_s21 = scalar_lea.vmem [#allocation3], %s4452_s2 }
 0xe51   : > { %s3300_s6 = sshll.u32 %s5148_s21, 4  ;;  %s4253_s27 = smov [#allocation3]   ;;  %s3301_s6 = int_to_ptr.vmem [resolvable:$true] %s3300_s6 }
 0xe52   : > { %s4142_s8 = scalar_lea.vmem %s3301_s6, 128  ;;  %s4146_s25 = sshll.u32 %s4253_s27, 4  ;;  %s4147_s25 = int_to_ptr.vmem [resolvable:$false] %s4146_s25 }
 0xe53   : > { %p4143_p2 = scmp.ne.s32.totalorder %s3301_s6, %s4142_s8  ;;  %s4148_s5 = scalar_lea.vmem %s4147_s25, 256 }
 0xe54   : > { %p4149_p6 = scmp.lt.s32.totalorder %s3301_s6, %s4147_s25  ;;  %p4150_p7 = scmp.lt.s32.totalorder %s4148_s5, %s4142_s8 }
 0xe55   : > { %s3555_s28 = sshll.u32 %s5144_s29, 7  ;;  %p4144_p4 = pnand %p4143_p2, %p4428_p3 }
 0xe56   : > { %s4989_s20 = scalar_lea.hbm %s5147_s11, %s3555_s28  ;;  %s5149_s0 = sand.u32 1, %s5145_s1  }
 0xe57   : > { %s3287_s24 = scalar_lea.sflag [#allocation4], %s5149_s0  ;;  %p4145_p5 = pneg %p4144_p4 }
 0xe58   : > { %p4151_p8 = por %p4150_p7, %p4149_p6 }
 0xe5a   : > { %p4152_p10 = pnand %p4151_p8, %p4145_p5 }
 0xe5c   : > { %4155 = shalt.err (!%p4152_p10)
}
 0xe5d   : > { %s4156_s2 = scalar_lea.hbm %s4989_s20, 128  ;;  %s4160_s1 = scalar_lea.hbm %s5147_s11, 256 }
 0xe5e   : > { %p4157_p11 = scmp.ne.s32.totalorder %s4989_s20, %s4156_s2  ;;  %p4161_p0 = scmp.lt.u32.totalorder %s4989_s20, %s5147_s11 }
 0xe5f   : > { %p4162_p1 = scmp.lt.u32.totalorder %s4160_s1, %s4156_s2  ;;  %p4164_p4 = scmp.lt.u32.totalorder %s4156_s2, %s4989_s20 }
 0xe60   : > { %p4158_p12 = pnand %p4157_p11, %p4428_p3 }
 0xe61   : > { %p4163_p2 = por %p4162_p1, %p4161_p0 }
 0xe62   : > { %p4159_p13 = pneg %p4158_p12 }
 0xe63   : > { %p4165_p5 = por %p4164_p4, %p4163_p2 }
 0xe65   : > { %p4166_p6 = pnand %p4165_p5, %p4159_p13 }
 0xe67   : > { %4169 = shalt.err (!%p4166_p6)
}
 0xe68   : > { %3989 = dma.vmem_to_hbm [thread:$0]  (%p4428_p3), %s3301_s6, 128, %s4989_s20, %s3287_s24  }
 0xe69 PF: > { %s5150_s23 = sld [smem:[#allocation12_spill]]  ;;  %s5151_s21 = sld [smem:[#allocation6_spill]] }
 0xe6f   : > { %p3995_p7 = scmp.ge.s32.totalorder %s5150_s23, 2  ;;  %s3312_s8 = sand.u32 1, %s5151_s21  }
 0xe70   : > { %s3313_s27 = scalar_lea.sflag [#allocation4], %s3312_s8 }
 0xe71   : > { %p3992_p8 = pnand %p3995_p7, %p4438_p9 }
 0xe73   : > { %4203 = dma.done.wait (!%p3992_p8), %s3313_s27, 128  }
 0xe74   : > { %4205 = vsyncadd (!%p3992_p8), %s3313_s27, 4294967168  ;;  %s37_s0 = sadd.s32 1, %s5150_s23   ;;  %s5153_s5 = sld [smem:[#allocation7_spill]] }
 0xe75   : > { %p34_p10 = scmp.ge.s32.totalorder %s37_s0, 6   ;;  %s5154_s26 = sld [smem:[#allocation8_spill]] }
 0xe76   : > { %s5155_s27 = sld [smem:[#allocation17_spill]]  ;;  %s5156_s28 = sld [smem:[#allocation10_spill]] }
 0xe77   : > { %s5157_s6 = sld [smem:[#allocation11_spill]]  ;;  %s5158_s2 = sld [smem:[#allocation13_spill]] }
 0xe78   : > { %s5159_s29 = sld [smem:[#allocation15_spill]]  ;;  %36 = sbr.rel (!%p34_p10) target bundleno = 22 (0x16), region = 192 }
 0xe7f   :  { %3318 = vsyncpa [#allocation4], 1 }
 0xe80   :  { %3320 = vsyncpa [#allocation4 + $0x1], 1 }

</bundles_post_ra>
